<compile_context>
chip_gen: v5e
topology: v5e:2x2
jax: 0.10.0
libtpu: 0.0.40
codegen_flags: <defaults>
</compile_context>

<pallas_src>
import functools

import jax
import jax.numpy as jnp
from jax.experimental import pallas as pl
from jax.experimental.pallas import tpu as pltpu

# ----------------------------- config (small) -------------------------------
VOCAB = 100
MAX_POS = 16
TYPE_VOCAB = 2
HIDDEN = 32
NUM_HEADS = 2
HEAD_DIM = HIDDEN // NUM_HEADS
FFN = 64
NUM_LAYERS = 2
NUM_LABELS = 6
LANE = 128                 # lane-dense output / vector-slab width
BATCH = 2
SEQ = 8
LN_EPS = 1e-12
BN_EPS = 1e-5
NEG_INF = -1e9

# row map of the packed (n_vecs, 128) f32 vector slab
(R_EMB_G, R_EMB_B, R_POOL_B, R_BN_G, R_BN_B, R_BN_MU, R_BN_VAR, R_CLS_B) = range(8)
N_GLOBAL_ROWS = 8
(PL_BQKV, PL_BO, PL_LN1G, PL_LN1B, PL_B1, PL_B2, PL_LN2G, PL_LN2B) = range(8)
ROWS_PER_LAYER = 8


# ----------------------------- fused kernel ---------------------------------
def _layernorm(x, g, b):
    mean = jnp.mean(x, axis=-1, keepdims=True)
    var = jnp.mean(jnp.square(x - mean), axis=-1, keepdims=True)
    return (x - mean) * jax.lax.rsqrt(var + LN_EPS) * g + b


def _fused_bert_kernel(*refs, num_layers, with_loss, batch, seq):
    # refs = inputs..., outputs..., scratch
    n_in = 9 + (1 if with_loss else 0)
    (x_ref, mask_ref, wqkv_ref, wo_ref, w1_ref, w2_ref,
     pool_w_ref, cls_w_ref, vecs_ref) = refs[:9]
    labels_ref = refs[9] if with_loss else None
    hidden_ref, logits_ref = refs[n_in], refs[n_in + 1]
    ctx_scr = refs[n_in + 2]                      # VMEM (B*S, H) f32 scratch

    bf16 = jnp.bfloat16
    h, nh, dh = HIDDEN, NUM_HEADS, HEAD_DIM
    scale = 1.0 / float(dh) ** 0.5
    n = batch * seq

    def vec(row, width=HIDDEN):
        # one static (1, width) slice out of the packed f32 vector slab
        return vecs_ref[row:row + 1, 0:width]

    # ---- embedding LayerNorm (residual stream stays f32) ----
    x = _layernorm(x_ref[...], vec(R_EMB_G), vec(R_EMB_B))            # (B*S, H)

    # additive attention mask built once in-kernel: (B, 1, S)
    add_mask = ((1.0 - mask_ref[...]) * NEG_INF).reshape(batch, 1, seq)

    # ---- transformer layers (fully unrolled; weights are (L, ...) stacks) ----
    for l in range(num_layers):
        base = N_GLOBAL_ROWS + l * ROWS_PER_LAYER

        # fused QKV projection: one MXU pass, lane width 3H
        qkv = jnp.dot(x.astype(bf16), wqkv_ref[l],
                      preferred_element_type=jnp.float32) + vec(base + PL_BQKV, 3 * h)
        qkv3 = qkv.reshape(batch, seq, 3 * h)     # f32; seq==8 keeps sublane tiling

        # attention batched over the batch dim; per-head ctx -> scratch lanes
        for hi in range(nh):
            c0 = hi * dh
            q_h = qkv3[:, :, c0:c0 + dh].astype(bf16)                   # (B, S, dh)
            k_h = qkv3[:, :, h + c0:h + c0 + dh].astype(bf16)
            v_h = qkv3[:, :, 2 * h + c0:2 * h + c0 + dh].astype(bf16)
            s = jnp.einsum("bsd,btd->bst", q_h, k_h,
                           preferred_element_type=jnp.float32) * scale  # (B, S, S)
            s = s + add_mask
            s = s - jnp.max(s, axis=-1, keepdims=True)
            p = jnp.exp(s)
            p = p / jnp.sum(p, axis=-1, keepdims=True)   # exact div (matches torch)
            ctx_h = jnp.einsum("bst,btd->bsd", p.astype(bf16), v_h,
                               preferred_element_type=jnp.float32)      # (B, S, dh)
            # static-offset scratch store instead of concatenate copy chains
            ctx_scr[:, c0:c0 + dh] = ctx_h.reshape(n, dh)

        # output projection + residual LayerNorm
        o = jnp.dot(ctx_scr[...].astype(bf16), wo_ref[l],
                    preferred_element_type=jnp.float32) + vec(base + PL_BO)
        x = _layernorm(x + o, vec(base + PL_LN1G), vec(base + PL_LN1B))

        # FFN + residual LayerNorm
        ff = jnp.dot(x.astype(bf16), w1_ref[l],
                     preferred_element_type=jnp.float32) + vec(base + PL_B1, FFN)
        # TODO(synk): HF BERT default is exact erf-GELU; tanh approximation used here.
        ff = jax.nn.gelu(ff, approximate=True)
        ff = jnp.dot(ff.astype(bf16), w2_ref[l],
                     preferred_element_type=jnp.float32) + vec(base + PL_B2)
        x = _layernorm(x + ff, vec(base + PL_LN2G), vec(base + PL_LN2B))

    # ---- last_hidden_state, lane-padded to 128 for a dense (unmasked) store ----
    x_pad = jnp.concatenate([x, jnp.zeros((n, LANE - h), jnp.float32)], axis=-1)
    hidden_ref[...] = x_pad

    # ---- pooler on the [CLS] rows (0, S, 2S, ...) via a strided sublane read ----
    cls_rows = hidden_ref[pl.ds(0, batch, stride=seq), :][:, :h]        # (B, H)
    pooled = jnp.tanh(
        jnp.dot(cls_rows.astype(bf16), pool_w_ref[...],
                preferred_element_type=jnp.float32) + vec(R_POOL_B))

    # ---- BatchNorm1d (eval: running stats) -> Dropout(identity) -> Linear ----
    # TODO(synk): train-mode BatchNorm (batch stats + running-stat update) not implemented.
    bn = ((pooled - vec(R_BN_MU)) * jax.lax.rsqrt(vec(R_BN_VAR) + BN_EPS)
          * vec(R_BN_G) + vec(R_BN_B))
    logits_pad = jnp.dot(bn.astype(bf16), cls_w_ref[...],
                         preferred_element_type=jnp.float32) + vec(R_CLS_B, LANE)

    if with_loss:
        # numerically-stable BCEWithLogits, mean reduction (matches torch)
        z = logits_pad[:, :NUM_LABELS]
        y = labels_ref[...]
        bce = jnp.maximum(z, 0.0) - z * y + jnp.log1p(jnp.exp(-jnp.abs(z)))
        loss11 = jnp.mean(bce, axis=(0, 1), keepdims=True)              # (1, 1)
        # fold the scalar loss into unused lane NUM_LABELS of the padded logits,
        # avoiding a separate (1,1) VMEM output tile / masked store.
        lane_idx = jax.lax.broadcasted_iota(jnp.int32, (batch, LANE), 1)
        logits_pad = jnp.where(lane_idx == NUM_LABELS,
                               jnp.broadcast_to(loss11, (batch, LANE)),
                               logits_pad)

    logits_ref[...] = logits_pad


# ----------------------------- parameter init -------------------------------
def init_params(key):
    def nrm(k, shape, scale=0.02):
        return (scale * jax.random.normal(k, shape)).astype(jnp.float32)

    keys = iter(jax.random.split(key, 8 + NUM_LAYERS * 8))
    p = {
        "word_emb": nrm(next(keys), (VOCAB, HIDDEN)),
        "pos_emb": nrm(next(keys), (MAX_POS, HIDDEN)),
        "type_emb": nrm(next(keys), (TYPE_VOCAB, HIDDEN)),
        "emb_ln_g": jnp.ones((HIDDEN,), jnp.float32),
        "emb_ln_b": jnp.zeros((HIDDEN,), jnp.float32),
        "pool_w": nrm(next(keys), (HIDDEN, HIDDEN)),
        "pool_b": jnp.zeros((HIDDEN,), jnp.float32),
        # BatchNorm1d defaults (weight=1, bias=0, running_mean=0, running_var=1)
        "bn_g": jnp.ones((HIDDEN,), jnp.float32),
        "bn_b": jnp.zeros((HIDDEN,), jnp.float32),
        "bn_mu": jnp.zeros((HIDDEN,), jnp.float32),
        "bn_var": jnp.ones((HIDDEN,), jnp.float32),
        "cls_w": nrm(next(keys), (HIDDEN, NUM_LABELS)),
        "cls_b": jnp.zeros((NUM_LABELS,), jnp.float32),
        "layers": [],
    }
    for _ in range(NUM_LAYERS):
        p["layers"].append(
            {
                # QKV stored pre-concatenated: (H, 3H) = [Q | K | V], head-major inside
                "wqkv": nrm(next(keys), (HIDDEN, 3 * HIDDEN)),
                "bqkv": jnp.zeros((3 * HIDDEN,), jnp.float32),
                "wo": nrm(next(keys), (HIDDEN, HIDDEN)),
                "bo": jnp.zeros((HIDDEN,), jnp.float32),
                "ln1_g": jnp.ones((HIDDEN,), jnp.float32),
                "ln1_b": jnp.zeros((HIDDEN,), jnp.float32),
                "w1": nrm(next(keys), (HIDDEN, FFN)),
                "b1": jnp.zeros((FFN,), jnp.float32),
                "w2": nrm(next(keys), (FFN, HIDDEN)),
                "b2": jnp.zeros((HIDDEN,), jnp.float32),
                "ln2_g": jnp.ones((HIDDEN,), jnp.float32),
                "ln2_b": jnp.zeros((HIDDEN,), jnp.float32),
            }
        )
    return p


# ----------------------------- forward pass ----------------------------------
def multi_label_bert_forward(params, input_ids, attention_mask, labels=None):
    b, s = input_ids.shape
    h = HIDDEN
    bf = jnp.bfloat16
    num_layers = len(params["layers"])

    # glue in plain JAX: embedding gathers + weight packing/casts
    x_emb = (
        params["word_emb"][input_ids]
        + params["pos_emb"][:s][None, :, :]
        + params["type_emb"][0][None, None, :]
    ).reshape(b * s, h).astype(jnp.float32)
    mask_f = attention_mask.astype(jnp.float32)

    # stacked per-layer matmul weights: 4 tensors instead of 4*L inputs
    wqkv_all = jnp.stack([l["wqkv"] for l in params["layers"]]).astype(bf)  # (L,H,3H)
    wo_all = jnp.stack([l["wo"] for l in params["layers"]]).astype(bf)      # (L,H,H)
    w1_all = jnp.stack([l["w1"] for l in params["layers"]]).astype(bf)      # (L,H,FFN)
    w2_all = jnp.stack([l["w2"] for l in params["layers"]]).astype(bf)      # (L,FFN,H)

    # every 1-D vector (biases / LN / BN / pooler / classifier bias) packed into
    # ONE lane-padded (n_vecs, 128) f32 slab, addressed by static row in-kernel
    def pad_row(v):
        v = jnp.asarray(v, jnp.float32).reshape(-1)
        return jnp.zeros((LANE,), jnp.float32).at[: v.shape[0]].set(v)

    rows = [params["emb_ln_g"], params["emb_ln_b"], params["pool_b"],
            params["bn_g"], params["bn_b"], params["bn_mu"], params["bn_var"],
            params["cls_b"]]
    for lyr in params["layers"]:
        rows += [lyr["bqkv"], lyr["bo"], lyr["ln1_g"], lyr["ln1_b"],
                 lyr["b1"], lyr["b2"], lyr["ln2_g"], lyr["ln2_b"]]
    vecs = jnp.stack([pad_row(r) for r in rows])                    # (n_vecs, 128)
    extra = (-vecs.shape[0]) % 8
    if extra:                                                       # sublane-align rows
        vecs = jnp.concatenate([vecs, jnp.zeros((extra, LANE), jnp.float32)], axis=0)

    cls_w_pad = jnp.zeros((h, LANE), jnp.float32).at[:, :NUM_LABELS].set(
        params["cls_w"]).astype(bf)

    inputs = [x_emb, mask_f, wqkv_all, wo_all, w1_all, w2_all,
              params["pool_w"].astype(bf), cls_w_pad, vecs]

    with_loss = labels is not None
    if with_loss:
        inputs.append(labels.astype(jnp.float32))

    out_shapes = (
        jax.ShapeDtypeStruct((b * s, LANE), jnp.float32),   # lane-padded last hidden
        jax.ShapeDtypeStruct((b, LANE), jnp.float32),       # lane-padded logits (+loss)
    )

    kern = functools.partial(_fused_bert_kernel, num_layers=num_layers,
                             with_loss=with_loss, batch=b, seq=s)
    # TODO(synk): at production BERT sizes, add a pipelined 'arbitrary' layer grid
    # axis over the (L, ...) weight stacks (bounds VMEM on v7x's 64 MiB) and a
    # 'parallel' batch/query-tile axis so both v7x TensorCores are used; at
    # B=2/S=8/H=32 a single grid-less call is the right shape.
    hidden_pad, logits_pad = pl.pallas_call(
        kern,
        out_shape=out_shapes,
        scratch_shapes=[pltpu.VMEM((b * s, h), jnp.float32)],
    )(*inputs)

    result = {
        "logits": logits_pad[:, :NUM_LABELS],
        "hidden_states": hidden_pad[:, :h].reshape(b, s, h),
        # outputs.attentions is None by default in the HF module; not materialized.
        "attention_weights": None,
    }
    if with_loss:
        result["loss"] = logits_pad[0, NUM_LABELS]
    return result


# ----------------------------------- main ------------------------------------
if __name__ == "__main__":
    key = jax.random.PRNGKey(0)
    k_param, k_ids, k_lab = jax.random.split(key, 3)

    params = init_params(k_param)

    input_ids = jax.random.randint(k_ids, (BATCH, SEQ), 0, VOCAB, dtype=jnp.int32)
    attention_mask = jnp.array(
        [[1, 1, 1, 1, 1, 1, 0, 0],
         [1, 1, 1, 1, 1, 1, 1, 1]], dtype=jnp.int32
    )
    labels = jax.random.bernoulli(k_lab, 0.5, (BATCH, NUM_LABELS)).astype(jnp.float32)

    fwd = jax.jit(multi_label_bert_forward)
    out = fwd(params, input_ids, attention_mask, labels)
    jax.block_until_ready(out)

    assert out["logits"].shape == (BATCH, NUM_LABELS)
    assert out["hidden_states"].shape == (BATCH, SEQ, HIDDEN)
    assert out["loss"].shape == ()
    assert bool(jnp.isfinite(out["loss"]))
    print("KERNEL_OK")
</pallas_src>

<mosaic_0001>
module attributes {stable_mosaic.version = 11 : i64} {
  func.func @_fused_bert_kernel(%arg0: memref<16x32xf32, #tpu.memory_space<vmem>>, %arg1: memref<2x8xf32, #tpu.memory_space<vmem>>, %arg2: memref<2x32x96xbf16, #tpu.memory_space<vmem>>, %arg3: memref<2x32x32xbf16, #tpu.memory_space<vmem>>, %arg4: memref<2x32x64xbf16, #tpu.memory_space<vmem>>, %arg5: memref<2x64x32xbf16, #tpu.memory_space<vmem>>, %arg6: memref<32x32xbf16, #tpu.memory_space<vmem>>, %arg7: memref<32x128xbf16, #tpu.memory_space<vmem>>, %arg8: memref<24x128xf32, #tpu.memory_space<vmem>>, %arg9: memref<2x6xf32, #tpu.memory_space<vmem>>, %arg10: memref<16x128xf32, #tpu.memory_space<vmem>>, %arg11: memref<2x128xf32, #tpu.memory_space<vmem>>, %arg12: memref<16x32xf32, #tpu.memory_space<vmem>>) attributes {dimension_semantics = [], scalar_prefetch = 0 : i64, scratch_operands = 1 : i64, tpu.core_type = #tpu.core_type<tc>} {
    %c0 = arith.constant 0 : index
    %c0_0 = arith.constant 0 : index
    %0 = vector.load %arg0[%c0, %c0_0] : memref<16x32xf32, #tpu.memory_space<vmem>>, vector<16x32xf32>
    %c0_1 = arith.constant 0 : index
    %c0_2 = arith.constant 0 : index
    %1 = vector.load %arg8[%c0_1, %c0_2] : memref<24x128xf32, #tpu.memory_space<vmem>>, vector<1x32xf32>
    %c1 = arith.constant 1 : index
    %c0_3 = arith.constant 0 : index
    %2 = vector.load %arg8[%c1, %c0_3] : memref<24x128xf32, #tpu.memory_space<vmem>>, vector<1x32xf32>
    %cst = arith.constant dense<0.000000e+00> : vector<16xf32>
    %3 = vector.multi_reduction <add>, %0, %cst [1] : vector<16x32xf32> to vector<16xf32>
    %4 = vector.shape_cast %3 : vector<16xf32> to vector<16x1xf32>
    %cst_4 = arith.constant 3.200000e+01 : f32
    %5 = vector.broadcast %cst_4 : f32 to vector<16x1xf32>
    %6 = arith.divf %4, %5 : vector<16x1xf32>
    %7 = vector.broadcast %6 : vector<16x1xf32> to vector<16x32xf32>
    %8 = arith.subf %0, %7 : vector<16x32xf32>
    %9 = arith.mulf %8, %8 : vector<16x32xf32>
    %cst_5 = arith.constant dense<0.000000e+00> : vector<16xf32>
    %10 = vector.multi_reduction <add>, %9, %cst_5 [1] : vector<16x32xf32> to vector<16xf32>
    %11 = vector.shape_cast %10 : vector<16xf32> to vector<16x1xf32>
    %cst_6 = arith.constant 3.200000e+01 : f32
    %12 = vector.broadcast %cst_6 : f32 to vector<16x1xf32>
    %13 = arith.divf %11, %12 : vector<16x1xf32>
    %14 = vector.broadcast %6 : vector<16x1xf32> to vector<16x32xf32>
    %15 = arith.subf %0, %14 : vector<16x32xf32>
    %cst_7 = arith.constant 9.99999996E-13 : f32
    %16 = vector.broadcast %cst_7 : f32 to vector<16x1xf32>
    %17 = arith.addf %13, %16 : vector<16x1xf32>
    %18 = math.rsqrt %17 : vector<16x1xf32>
    %19 = vector.broadcast %18 : vector<16x1xf32> to vector<16x32xf32>
    %20 = arith.mulf %15, %19 : vector<16x32xf32>
    %21 = vector.broadcast %1 : vector<1x32xf32> to vector<16x32xf32>
    %22 = arith.mulf %20, %21 : vector<16x32xf32>
    %23 = vector.broadcast %2 : vector<1x32xf32> to vector<16x32xf32>
    %24 = arith.addf %22, %23 : vector<16x32xf32>
    %c0_8 = arith.constant 0 : index
    %c0_9 = arith.constant 0 : index
    %25 = vector.load %arg1[%c0_8, %c0_9] : memref<2x8xf32, #tpu.memory_space<vmem>>, vector<2x8xf32>
    %cst_10 = arith.constant 1.000000e+00 : f32
    %26 = vector.broadcast %cst_10 : f32 to vector<2x8xf32>
    %27 = arith.subf %26, %25 : vector<2x8xf32>
    %cst_11 = arith.constant -1.000000e+09 : f32
    %28 = vector.broadcast %cst_11 : f32 to vector<2x8xf32>
    %29 = arith.mulf %27, %28 : vector<2x8xf32>
    %30 = vector.shape_cast %29 : vector<2x8xf32> to vector<2x1x8xf32>
    %31 = arith.truncf %24 : vector<16x32xf32> to vector<16x32xbf16>
    %c0_12 = arith.constant 0 : index
    %c0_13 = arith.constant 0 : index
    %c0_14 = arith.constant 0 : index
    %32 = vector.load %arg2[%c0_12, %c0_13, %c0_14] : memref<2x32x96xbf16, #tpu.memory_space<vmem>>, vector<1x32x96xbf16>
    %33 = vector.shape_cast %32 : vector<1x32x96xbf16> to vector<32x96xbf16>
    %cst_15 = arith.constant dense<0.000000e+00> : vector<16x96xf32>
    %34 = tpu.matmul %31, %33, %cst_15 {dimension_numbers = #tpu.dot_dimension_numbers<[1], [0], [0], [1], [0, 0, 1, 1], [], []>} : vector<16x32xbf16>, vector<32x96xbf16>, vector<16x96xf32> -> vector<16x96xf32>
    %c8 = arith.constant 8 : index
    %c0_16 = arith.constant 0 : index
    %35 = vector.load %arg8[%c8, %c0_16] : memref<24x128xf32, #tpu.memory_space<vmem>>, vector<1x96xf32>
    %36 = vector.broadcast %35 : vector<1x96xf32> to vector<16x96xf32>
    %37 = arith.addf %34, %36 : vector<16x96xf32>
    %38 = vector.shape_cast %37 : vector<16x96xf32> to vector<2x8x96xf32>
    %39 = vector.extract_strided_slice %38 {offsets = [0, 0, 0], sizes = [2, 8, 16], strides = [1, 1, 1]} : vector<2x8x96xf32> to vector<2x8x16xf32>
    %40 = arith.truncf %39 : vector<2x8x16xf32> to vector<2x8x16xbf16>
    %41 = vector.extract_strided_slice %38 {offsets = [0, 0, 32], sizes = [2, 8, 16], strides = [1, 1, 1]} : vector<2x8x96xf32> to vector<2x8x16xf32>
    %42 = arith.truncf %41 : vector<2x8x16xf32> to vector<2x8x16xbf16>
    %43 = vector.extract_strided_slice %38 {offsets = [0, 0, 64], sizes = [2, 8, 16], strides = [1, 1, 1]} : vector<2x8x96xf32> to vector<2x8x16xf32>
    %44 = arith.truncf %43 : vector<2x8x16xf32> to vector<2x8x16xbf16>
    "tpu.trace_start"() <{level = 10 : i32, message = "bsd,btd->bst"}> : () -> ()
    %cst_17 = arith.constant dense<0.000000e+00> : vector<2x8x8xf32>
    %45 = tpu.matmul %40, %42, %cst_17 {dimension_numbers = #tpu.dot_dimension_numbers<[2], [2], [1], [1], [0, 0, 0, 1, 1, 1], [0], [0]>} : vector<2x8x16xbf16>, vector<2x8x16xbf16>, vector<2x8x8xf32> -> vector<2x8x8xf32>
    "tpu.trace_stop"() : () -> ()
    %cst_18 = arith.constant 2.500000e-01 : f32
    %46 = vector.broadcast %cst_18 : f32 to vector<2x8x8xf32>
    %47 = arith.mulf %45, %46 : vector<2x8x8xf32>
    %48 = vector.broadcast %30 : vector<2x1x8xf32> to vector<2x8x8xf32>
    %49 = arith.addf %47, %48 : vector<2x8x8xf32>
    %cst_19 = arith.constant dense<0xFF800000> : vector<2x8xf32>
    %50 = vector.multi_reduction <maximumf>, %49, %cst_19 [2] : vector<2x8x8xf32> to vector<2x8xf32>
    %51 = vector.shape_cast %50 : vector<2x8xf32> to vector<2x8x1xf32>
    %52 = vector.broadcast %51 : vector<2x8x1xf32> to vector<2x8x8xf32>
    %53 = arith.subf %49, %52 : vector<2x8x8xf32>
    %54 = math.exp %53 : vector<2x8x8xf32>
    %cst_20 = arith.constant dense<0.000000e+00> : vector<2x8xf32>
    %55 = vector.multi_reduction <add>, %54, %cst_20 [2] : vector<2x8x8xf32> to vector<2x8xf32>
    %56 = vector.shape_cast %55 : vector<2x8xf32> to vector<2x8x1xf32>
    %57 = vector.broadcast %56 : vector<2x8x1xf32> to vector<2x8x8xf32>
    %58 = arith.divf %54, %57 : vector<2x8x8xf32>
    %59 = arith.truncf %58 : vector<2x8x8xf32> to vector<2x8x8xbf16>
    "tpu.trace_start"() <{level = 10 : i32, message = "bst,btd->bsd"}> : () -> ()
    %cst_21 = arith.constant dense<0.000000e+00> : vector<2x8x16xf32>
    %60 = tpu.matmul %59, %44, %cst_21 {dimension_numbers = #tpu.dot_dimension_numbers<[2], [1], [1], [2], [0, 0, 0, 1, 1, 2], [0], [0]>} : vector<2x8x8xbf16>, vector<2x8x16xbf16>, vector<2x8x16xf32> -> vector<2x8x16xf32>
    "tpu.trace_stop"() : () -> ()
    %61 = vector.shape_cast %60 : vector<2x8x16xf32> to vector<16x16xf32>
    %c0_22 = arith.constant 0 : index
    %c0_23 = arith.constant 0 : index
    %62 = vector.load %arg12[%c0_22, %c0_23] : memref<16x32xf32, #tpu.memory_space<vmem>>, vector<16x16xf32>
    tpu.vector_store %arg12[%c0_22, %c0_23], %61 {strides = array<i32>} : memref<16x32xf32, #tpu.memory_space<vmem>>, vector<16x16xf32>,
    %63 = vector.extract_strided_slice %38 {offsets = [0, 0, 16], sizes = [2, 8, 16], strides = [1, 1, 1]} : vector<2x8x96xf32> to vector<2x8x16xf32>
    %64 = arith.truncf %63 : vector<2x8x16xf32> to vector<2x8x16xbf16>
    %65 = vector.extract_strided_slice %38 {offsets = [0, 0, 48], sizes = [2, 8, 16], strides = [1, 1, 1]} : vector<2x8x96xf32> to vector<2x8x16xf32>
    %66 = arith.truncf %65 : vector<2x8x16xf32> to vector<2x8x16xbf16>
    %67 = vector.extract_strided_slice %38 {offsets = [0, 0, 80], sizes = [2, 8, 16], strides = [1, 1, 1]} : vector<2x8x96xf32> to vector<2x8x16xf32>
    %68 = arith.truncf %67 : vector<2x8x16xf32> to vector<2x8x16xbf16>
    "tpu.trace_start"() <{level = 10 : i32, message = "bsd,btd->bst"}> : () -> ()
    %cst_24 = arith.constant dense<0.000000e+00> : vector<2x8x8xf32>
    %69 = tpu.matmul %64, %66, %cst_24 {dimension_numbers = #tpu.dot_dimension_numbers<[2], [2], [1], [1], [0, 0, 0, 1, 1, 1], [0], [0]>} : vector<2x8x16xbf16>, vector<2x8x16xbf16>, vector<2x8x8xf32> -> vector<2x8x8xf32>
    "tpu.trace_stop"() : () -> ()
    %cst_25 = arith.constant 2.500000e-01 : f32
    %70 = vector.broadcast %cst_25 : f32 to vector<2x8x8xf32>
    %71 = arith.mulf %69, %70 : vector<2x8x8xf32>
    %72 = vector.broadcast %30 : vector<2x1x8xf32> to vector<2x8x8xf32>
    %73 = arith.addf %71, %72 : vector<2x8x8xf32>
    %cst_26 = arith.constant dense<0xFF800000> : vector<2x8xf32>
    %74 = vector.multi_reduction <maximumf>, %73, %cst_26 [2] : vector<2x8x8xf32> to vector<2x8xf32>
    %75 = vector.shape_cast %74 : vector<2x8xf32> to vector<2x8x1xf32>
    %76 = vector.broadcast %75 : vector<2x8x1xf32> to vector<2x8x8xf32>
    %77 = arith.subf %73, %76 : vector<2x8x8xf32>
    %78 = math.exp %77 : vector<2x8x8xf32>
    %cst_27 = arith.constant dense<0.000000e+00> : vector<2x8xf32>
    %79 = vector.multi_reduction <add>, %78, %cst_27 [2] : vector<2x8x8xf32> to vector<2x8xf32>
    %80 = vector.shape_cast %79 : vector<2x8xf32> to vector<2x8x1xf32>
    %81 = vector.broadcast %80 : vector<2x8x1xf32> to vector<2x8x8xf32>
    %82 = arith.divf %78, %81 : vector<2x8x8xf32>
    %83 = arith.truncf %82 : vector<2x8x8xf32> to vector<2x8x8xbf16>
    "tpu.trace_start"() <{level = 10 : i32, message = "bst,btd->bsd"}> : () -> ()
    %cst_28 = arith.constant dense<0.000000e+00> : vector<2x8x16xf32>
    %84 = tpu.matmul %83, %68, %cst_28 {dimension_numbers = #tpu.dot_dimension_numbers<[2], [1], [1], [2], [0, 0, 0, 1, 1, 2], [0], [0]>} : vector<2x8x8xbf16>, vector<2x8x16xbf16>, vector<2x8x16xf32> -> vector<2x8x16xf32>
    "tpu.trace_stop"() : () -> ()
    %85 = vector.shape_cast %84 : vector<2x8x16xf32> to vector<16x16xf32>
    %c0_29 = arith.constant 0 : index
    %c16 = arith.constant 16 : index
    %86 = vector.load %arg12[%c0_29, %c16] : memref<16x32xf32, #tpu.memory_space<vmem>>, vector<16x16xf32>
    tpu.vector_store %arg12[%c0_29, %c16], %85 {strides = array<i32>} : memref<16x32xf32, #tpu.memory_space<vmem>>, vector<16x16xf32>,
    %c0_30 = arith.constant 0 : index
    %c0_31 = arith.constant 0 : index
    %87 = vector.load %arg12[%c0_30, %c0_31] : memref<16x32xf32, #tpu.memory_space<vmem>>, vector<16x32xf32>
    %88 = arith.truncf %87 : vector<16x32xf32> to vector<16x32xbf16>
    %c0_32 = arith.constant 0 : index
    %c0_33 = arith.constant 0 : index
    %c0_34 = arith.constant 0 : index
    %89 = vector.load %arg3[%c0_32, %c0_33, %c0_34] : memref<2x32x32xbf16, #tpu.memory_space<vmem>>, vector<1x32x32xbf16>
    %90 = vector.shape_cast %89 : vector<1x32x32xbf16> to vector<32x32xbf16>
    %cst_35 = arith.constant dense<0.000000e+00> : vector<16x32xf32>
    %91 = tpu.matmul %88, %90, %cst_35 {dimension_numbers = #tpu.dot_dimension_numbers<[1], [0], [0], [1], [0, 0, 1, 1], [], []>} : vector<16x32xbf16>, vector<32x32xbf16>, vector<16x32xf32> -> vector<16x32xf32>
    %c9 = arith.constant 9 : index
    %c0_36 = arith.constant 0 : index
    %92 = vector.load %arg8[%c9, %c0_36] : memref<24x128xf32, #tpu.memory_space<vmem>>, vector<1x32xf32>
    %93 = vector.broadcast %92 : vector<1x32xf32> to vector<16x32xf32>
    %94 = arith.addf %91, %93 : vector<16x32xf32>
    %95 = arith.addf %24, %94 : vector<16x32xf32>
    %c10 = arith.constant 10 : index
    %c0_37 = arith.constant 0 : index
    %96 = vector.load %arg8[%c10, %c0_37] : memref<24x128xf32, #tpu.memory_space<vmem>>, vector<1x32xf32>
    %c11 = arith.constant 11 : index
    %c0_38 = arith.constant 0 : index
    %97 = vector.load %arg8[%c11, %c0_38] : memref<24x128xf32, #tpu.memory_space<vmem>>, vector<1x32xf32>
    %cst_39 = arith.constant dense<0.000000e+00> : vector<16xf32>
    %98 = vector.multi_reduction <add>, %95, %cst_39 [1] : vector<16x32xf32> to vector<16xf32>
    %99 = vector.shape_cast %98 : vector<16xf32> to vector<16x1xf32>
    %cst_40 = arith.constant 3.200000e+01 : f32
    %100 = vector.broadcast %cst_40 : f32 to vector<16x1xf32>
    %101 = arith.divf %99, %100 : vector<16x1xf32>
    %102 = vector.broadcast %101 : vector<16x1xf32> to vector<16x32xf32>
    %103 = arith.subf %95, %102 : vector<16x32xf32>
    %104 = arith.mulf %103, %103 : vector<16x32xf32>
    %cst_41 = arith.constant dense<0.000000e+00> : vector<16xf32>
    %105 = vector.multi_reduction <add>, %104, %cst_41 [1] : vector<16x32xf32> to vector<16xf32>
    %106 = vector.shape_cast %105 : vector<16xf32> to vector<16x1xf32>
    %cst_42 = arith.constant 3.200000e+01 : f32
    %107 = vector.broadcast %cst_42 : f32 to vector<16x1xf32>
    %108 = arith.divf %106, %107 : vector<16x1xf32>
    %109 = vector.broadcast %101 : vector<16x1xf32> to vector<16x32xf32>
    %110 = arith.subf %95, %109 : vector<16x32xf32>
    %cst_43 = arith.constant 9.99999996E-13 : f32
    %111 = vector.broadcast %cst_43 : f32 to vector<16x1xf32>
    %112 = arith.addf %108, %111 : vector<16x1xf32>
    %113 = math.rsqrt %112 : vector<16x1xf32>
    %114 = vector.broadcast %113 : vector<16x1xf32> to vector<16x32xf32>
    %115 = arith.mulf %110, %114 : vector<16x32xf32>
    %116 = vector.broadcast %96 : vector<1x32xf32> to vector<16x32xf32>
    %117 = arith.mulf %115, %116 : vector<16x32xf32>
    %118 = vector.broadcast %97 : vector<1x32xf32> to vector<16x32xf32>
    %119 = arith.addf %117, %118 : vector<16x32xf32>
    %120 = arith.truncf %119 : vector<16x32xf32> to vector<16x32xbf16>
    %c0_44 = arith.constant 0 : index
    %c0_45 = arith.constant 0 : index
    %c0_46 = arith.constant 0 : index
    %121 = vector.load %arg4[%c0_44, %c0_45, %c0_46] : memref<2x32x64xbf16, #tpu.memory_space<vmem>>, vector<1x32x64xbf16>
    %122 = vector.shape_cast %121 : vector<1x32x64xbf16> to vector<32x64xbf16>
    %cst_47 = arith.constant dense<0.000000e+00> : vector<16x64xf32>
    %123 = tpu.matmul %120, %122, %cst_47 {dimension_numbers = #tpu.dot_dimension_numbers<[1], [0], [0], [1], [0, 0, 1, 1], [], []>} : vector<16x32xbf16>, vector<32x64xbf16>, vector<16x64xf32> -> vector<16x64xf32>
    %c12 = arith.constant 12 : index
    %c0_48 = arith.constant 0 : index
    %124 = vector.load %arg8[%c12, %c0_48] : memref<24x128xf32, #tpu.memory_space<vmem>>, vector<1x64xf32>
    %125 = vector.broadcast %124 : vector<1x64xf32> to vector<16x64xf32>
    %126 = arith.addf %123, %125 : vector<16x64xf32>
    %127 = arith.mulf %126, %126 : vector<16x64xf32>
    %128 = arith.mulf %126, %127 : vector<16x64xf32>
    %cst_49 = arith.constant 4.471500e-02 : f32
    %129 = vector.broadcast %cst_49 : f32 to vector<16x64xf32>
    %130 = arith.mulf %129, %128 : vector<16x64xf32>
    %131 = arith.addf %126, %130 : vector<16x64xf32>
    %cst_50 = arith.constant 0.797884583 : f32
    %132 = vector.broadcast %cst_50 : f32 to vector<16x64xf32>
    %133 = arith.mulf %132, %131 : vector<16x64xf32>
    %134 = math.tanh %133 : vector<16x64xf32>
    %cst_51 = arith.constant 1.000000e+00 : f32
    %135 = vector.broadcast %cst_51 : f32 to vector<16x64xf32>
    %136 = arith.addf %135, %134 : vector<16x64xf32>
    %cst_52 = arith.constant 5.000000e-01 : f32
    %137 = vector.broadcast %cst_52 : f32 to vector<16x64xf32>
    %138 = arith.mulf %137, %136 : vector<16x64xf32>
    %139 = arith.mulf %126, %138 : vector<16x64xf32>
    %140 = arith.truncf %139 : vector<16x64xf32> to vector<16x64xbf16>
    %c0_53 = arith.constant 0 : index
    %c0_54 = arith.constant 0 : index
    %c0_55 = arith.constant 0 : index
    %141 = vector.load %arg5[%c0_53, %c0_54, %c0_55] : memref<2x64x32xbf16, #tpu.memory_space<vmem>>, vector<1x64x32xbf16>
    %142 = vector.shape_cast %141 : vector<1x64x32xbf16> to vector<64x32xbf16>
    %cst_56 = arith.constant dense<0.000000e+00> : vector<16x32xf32>
    %143 = tpu.matmul %140, %142, %cst_56 {dimension_numbers = #tpu.dot_dimension_numbers<[1], [0], [0], [1], [0, 0, 1, 1], [], []>} : vector<16x64xbf16>, vector<64x32xbf16>, vector<16x32xf32> -> vector<16x32xf32>
    %c13 = arith.constant 13 : index
    %c0_57 = arith.constant 0 : index
    %144 = vector.load %arg8[%c13, %c0_57] : memref<24x128xf32, #tpu.memory_space<vmem>>, vector<1x32xf32>
    %145 = vector.broadcast %144 : vector<1x32xf32> to vector<16x32xf32>
    %146 = arith.addf %143, %145 : vector<16x32xf32>
    %147 = arith.addf %119, %146 : vector<16x32xf32>
    %c14 = arith.constant 14 : index
    %c0_58 = arith.constant 0 : index
    %148 = vector.load %arg8[%c14, %c0_58] : memref<24x128xf32, #tpu.memory_space<vmem>>, vector<1x32xf32>
    %c15 = arith.constant 15 : index
    %c0_59 = arith.constant 0 : index
    %149 = vector.load %arg8[%c15, %c0_59] : memref<24x128xf32, #tpu.memory_space<vmem>>, vector<1x32xf32>
    %cst_60 = arith.constant dense<0.000000e+00> : vector<16xf32>
    %150 = vector.multi_reduction <add>, %147, %cst_60 [1] : vector<16x32xf32> to vector<16xf32>
    %151 = vector.shape_cast %150 : vector<16xf32> to vector<16x1xf32>
    %cst_61 = arith.constant 3.200000e+01 : f32
    %152 = vector.broadcast %cst_61 : f32 to vector<16x1xf32>
    %153 = arith.divf %151, %152 : vector<16x1xf32>
    %154 = vector.broadcast %153 : vector<16x1xf32> to vector<16x32xf32>
    %155 = arith.subf %147, %154 : vector<16x32xf32>
    %156 = arith.mulf %155, %155 : vector<16x32xf32>
    %cst_62 = arith.constant dense<0.000000e+00> : vector<16xf32>
    %157 = vector.multi_reduction <add>, %156, %cst_62 [1] : vector<16x32xf32> to vector<16xf32>
    %158 = vector.shape_cast %157 : vector<16xf32> to vector<16x1xf32>
    %cst_63 = arith.constant 3.200000e+01 : f32
    %159 = vector.broadcast %cst_63 : f32 to vector<16x1xf32>
    %160 = arith.divf %158, %159 : vector<16x1xf32>
    %161 = vector.broadcast %153 : vector<16x1xf32> to vector<16x32xf32>
    %162 = arith.subf %147, %161 : vector<16x32xf32>
    %cst_64 = arith.constant 9.99999996E-13 : f32
    %163 = vector.broadcast %cst_64 : f32 to vector<16x1xf32>
    %164 = arith.addf %160, %163 : vector<16x1xf32>
    %165 = math.rsqrt %164 : vector<16x1xf32>
    %166 = vector.broadcast %165 : vector<16x1xf32> to vector<16x32xf32>
    %167 = arith.mulf %162, %166 : vector<16x32xf32>
    %168 = vector.broadcast %148 : vector<1x32xf32> to vector<16x32xf32>
    %169 = arith.mulf %167, %168 : vector<16x32xf32>
    %170 = vector.broadcast %149 : vector<1x32xf32> to vector<16x32xf32>
    %171 = arith.addf %169, %170 : vector<16x32xf32>
    %172 = arith.truncf %171 : vector<16x32xf32> to vector<16x32xbf16>
    %c1_65 = arith.constant 1 : index
    %c0_66 = arith.constant 0 : index
    %c0_67 = arith.constant 0 : index
    %173 = vector.load %arg2[%c1_65, %c0_66, %c0_67] : memref<2x32x96xbf16, #tpu.memory_space<vmem>>, vector<1x32x96xbf16>
    %174 = vector.shape_cast %173 : vector<1x32x96xbf16> to vector<32x96xbf16>
    %cst_68 = arith.constant dense<0.000000e+00> : vector<16x96xf32>
    %175 = tpu.matmul %172, %174, %cst_68 {dimension_numbers = #tpu.dot_dimension_numbers<[1], [0], [0], [1], [0, 0, 1, 1], [], []>} : vector<16x32xbf16>, vector<32x96xbf16>, vector<16x96xf32> -> vector<16x96xf32>
    %c16_69 = arith.constant 16 : index
    %c0_70 = arith.constant 0 : index
    %176 = vector.load %arg8[%c16_69, %c0_70] : memref<24x128xf32, #tpu.memory_space<vmem>>, vector<1x96xf32>
    %177 = vector.broadcast %176 : vector<1x96xf32> to vector<16x96xf32>
    %178 = arith.addf %175, %177 : vector<16x96xf32>
    %179 = vector.shape_cast %178 : vector<16x96xf32> to vector<2x8x96xf32>
    %180 = vector.extract_strided_slice %179 {offsets = [0, 0, 0], sizes = [2, 8, 16], strides = [1, 1, 1]} : vector<2x8x96xf32> to vector<2x8x16xf32>
    %181 = arith.truncf %180 : vector<2x8x16xf32> to vector<2x8x16xbf16>
    %182 = vector.extract_strided_slice %179 {offsets = [0, 0, 32], sizes = [2, 8, 16], strides = [1, 1, 1]} : vector<2x8x96xf32> to vector<2x8x16xf32>
    %183 = arith.truncf %182 : vector<2x8x16xf32> to vector<2x8x16xbf16>
    %184 = vector.extract_strided_slice %179 {offsets = [0, 0, 64], sizes = [2, 8, 16], strides = [1, 1, 1]} : vector<2x8x96xf32> to vector<2x8x16xf32>
    %185 = arith.truncf %184 : vector<2x8x16xf32> to vector<2x8x16xbf16>
    "tpu.trace_start"() <{level = 10 : i32, message = "bsd,btd->bst"}> : () -> ()
    %cst_71 = arith.constant dense<0.000000e+00> : vector<2x8x8xf32>
    %186 = tpu.matmul %181, %183, %cst_71 {dimension_numbers = #tpu.dot_dimension_numbers<[2], [2], [1], [1], [0, 0, 0, 1, 1, 1], [0], [0]>} : vector<2x8x16xbf16>, vector<2x8x16xbf16>, vector<2x8x8xf32> -> vector<2x8x8xf32>
    "tpu.trace_stop"() : () -> ()
    %cst_72 = arith.constant 2.500000e-01 : f32
    %187 = vector.broadcast %cst_72 : f32 to vector<2x8x8xf32>
    %188 = arith.mulf %186, %187 : vector<2x8x8xf32>
    %189 = vector.broadcast %30 : vector<2x1x8xf32> to vector<2x8x8xf32>
    %190 = arith.addf %188, %189 : vector<2x8x8xf32>
    %cst_73 = arith.constant dense<0xFF800000> : vector<2x8xf32>
    %191 = vector.multi_reduction <maximumf>, %190, %cst_73 [2] : vector<2x8x8xf32> to vector<2x8xf32>
    %192 = vector.shape_cast %191 : vector<2x8xf32> to vector<2x8x1xf32>
    %193 = vector.broadcast %192 : vector<2x8x1xf32> to vector<2x8x8xf32>
    %194 = arith.subf %190, %193 : vector<2x8x8xf32>
    %195 = math.exp %194 : vector<2x8x8xf32>
    %cst_74 = arith.constant dense<0.000000e+00> : vector<2x8xf32>
    %196 = vector.multi_reduction <add>, %195, %cst_74 [2] : vector<2x8x8xf32> to vector<2x8xf32>
    %197 = vector.shape_cast %196 : vector<2x8xf32> to vector<2x8x1xf32>
    %198 = vector.broadcast %197 : vector<2x8x1xf32> to vector<2x8x8xf32>
    %199 = arith.divf %195, %198 : vector<2x8x8xf32>
    %200 = arith.truncf %199 : vector<2x8x8xf32> to vector<2x8x8xbf16>
    "tpu.trace_start"() <{level = 10 : i32, message = "bst,btd->bsd"}> : () -> ()
    %cst_75 = arith.constant dense<0.000000e+00> : vector<2x8x16xf32>
    %201 = tpu.matmul %200, %185, %cst_75 {dimension_numbers = #tpu.dot_dimension_numbers<[2], [1], [1], [2], [0, 0, 0, 1, 1, 2], [0], [0]>} : vector<2x8x8xbf16>, vector<2x8x16xbf16>, vector<2x8x16xf32> -> vector<2x8x16xf32>
    "tpu.trace_stop"() : () -> ()
    %202 = vector.shape_cast %201 : vector<2x8x16xf32> to vector<16x16xf32>
    %c0_76 = arith.constant 0 : index
    %c0_77 = arith.constant 0 : index
    %203 = vector.load %arg12[%c0_76, %c0_77] : memref<16x32xf32, #tpu.memory_space<vmem>>, vector<16x16xf32>
    tpu.vector_store %arg12[%c0_76, %c0_77], %202 {strides = array<i32>} : memref<16x32xf32, #tpu.memory_space<vmem>>, vector<16x16xf32>,
    %204 = vector.extract_strided_slice %179 {offsets = [0, 0, 16], sizes = [2, 8, 16], strides = [1, 1, 1]} : vector<2x8x96xf32> to vector<2x8x16xf32>
    %205 = arith.truncf %204 : vector<2x8x16xf32> to vector<2x8x16xbf16>
    %206 = vector.extract_strided_slice %179 {offsets = [0, 0, 48], sizes = [2, 8, 16], strides = [1, 1, 1]} : vector<2x8x96xf32> to vector<2x8x16xf32>
    %207 = arith.truncf %206 : vector<2x8x16xf32> to vector<2x8x16xbf16>
    %208 = vector.extract_strided_slice %179 {offsets = [0, 0, 80], sizes = [2, 8, 16], strides = [1, 1, 1]} : vector<2x8x96xf32> to vector<2x8x16xf32>
    %209 = arith.truncf %208 : vector<2x8x16xf32> to vector<2x8x16xbf16>
    "tpu.trace_start"() <{level = 10 : i32, message = "bsd,btd->bst"}> : () -> ()
    %cst_78 = arith.constant dense<0.000000e+00> : vector<2x8x8xf32>
    %210 = tpu.matmul %205, %207, %cst_78 {dimension_numbers = #tpu.dot_dimension_numbers<[2], [2], [1], [1], [0, 0, 0, 1, 1, 1], [0], [0]>} : vector<2x8x16xbf16>, vector<2x8x16xbf16>, vector<2x8x8xf32> -> vector<2x8x8xf32>
    "tpu.trace_stop"() : () -> ()
    %cst_79 = arith.constant 2.500000e-01 : f32
    %211 = vector.broadcast %cst_79 : f32 to vector<2x8x8xf32>
    %212 = arith.mulf %210, %211 : vector<2x8x8xf32>
    %213 = vector.broadcast %30 : vector<2x1x8xf32> to vector<2x8x8xf32>
    %214 = arith.addf %212, %213 : vector<2x8x8xf32>
    %cst_80 = arith.constant dense<0xFF800000> : vector<2x8xf32>
    %215 = vector.multi_reduction <maximumf>, %214, %cst_80 [2] : vector<2x8x8xf32> to vector<2x8xf32>
    %216 = vector.shape_cast %215 : vector<2x8xf32> to vector<2x8x1xf32>
    %217 = vector.broadcast %216 : vector<2x8x1xf32> to vector<2x8x8xf32>
    %218 = arith.subf %214, %217 : vector<2x8x8xf32>
    %219 = math.exp %218 : vector<2x8x8xf32>
    %cst_81 = arith.constant dense<0.000000e+00> : vector<2x8xf32>
    %220 = vector.multi_reduction <add>, %219, %cst_81 [2] : vector<2x8x8xf32> to vector<2x8xf32>
    %221 = vector.shape_cast %220 : vector<2x8xf32> to vector<2x8x1xf32>
    %222 = vector.broadcast %221 : vector<2x8x1xf32> to vector<2x8x8xf32>
    %223 = arith.divf %219, %222 : vector<2x8x8xf32>
    %224 = arith.truncf %223 : vector<2x8x8xf32> to vector<2x8x8xbf16>
    "tpu.trace_start"() <{level = 10 : i32, message = "bst,btd->bsd"}> : () -> ()
    %cst_82 = arith.constant dense<0.000000e+00> : vector<2x8x16xf32>
    %225 = tpu.matmul %224, %209, %cst_82 {dimension_numbers = #tpu.dot_dimension_numbers<[2], [1], [1], [2], [0, 0, 0, 1, 1, 2], [0], [0]>} : vector<2x8x8xbf16>, vector<2x8x16xbf16>, vector<2x8x16xf32> -> vector<2x8x16xf32>
    "tpu.trace_stop"() : () -> ()
    %226 = vector.shape_cast %225 : vector<2x8x16xf32> to vector<16x16xf32>
    %c0_83 = arith.constant 0 : index
    %c16_84 = arith.constant 16 : index
    %227 = vector.load %arg12[%c0_83, %c16_84] : memref<16x32xf32, #tpu.memory_space<vmem>>, vector<16x16xf32>
    tpu.vector_store %arg12[%c0_83, %c16_84], %226 {strides = array<i32>} : memref<16x32xf32, #tpu.memory_space<vmem>>, vector<16x16xf32>,
    %c0_85 = arith.constant 0 : index
    %c0_86 = arith.constant 0 : index
    %228 = vector.load %arg12[%c0_85, %c0_86] : memref<16x32xf32, #tpu.memory_space<vmem>>, vector<16x32xf32>
    %229 = arith.truncf %228 : vector<16x32xf32> to vector<16x32xbf16>
    %c1_87 = arith.constant 1 : index
    %c0_88 = arith.constant 0 : index
    %c0_89 = arith.constant 0 : index
    %230 = vector.load %arg3[%c1_87, %c0_88, %c0_89] : memref<2x32x32xbf16, #tpu.memory_space<vmem>>, vector<1x32x32xbf16>
    %231 = vector.shape_cast %230 : vector<1x32x32xbf16> to vector<32x32xbf16>
    %cst_90 = arith.constant dense<0.000000e+00> : vector<16x32xf32>
    %232 = tpu.matmul %229, %231, %cst_90 {dimension_numbers = #tpu.dot_dimension_numbers<[1], [0], [0], [1], [0, 0, 1, 1], [], []>} : vector<16x32xbf16>, vector<32x32xbf16>, vector<16x32xf32> -> vector<16x32xf32>
    %c17 = arith.constant 17 : index
    %c0_91 = arith.constant 0 : index
    %233 = vector.load %arg8[%c17, %c0_91] : memref<24x128xf32, #tpu.memory_space<vmem>>, vector<1x32xf32>
    %234 = vector.broadcast %233 : vector<1x32xf32> to vector<16x32xf32>
    %235 = arith.addf %232, %234 : vector<16x32xf32>
    %236 = arith.addf %171, %235 : vector<16x32xf32>
    %c18 = arith.constant 18 : index
    %c0_92 = arith.constant 0 : index
    %237 = vector.load %arg8[%c18, %c0_92] : memref<24x128xf32, #tpu.memory_space<vmem>>, vector<1x32xf32>
    %c19 = arith.constant 19 : index
    %c0_93 = arith.constant 0 : index
    %238 = vector.load %arg8[%c19, %c0_93] : memref<24x128xf32, #tpu.memory_space<vmem>>, vector<1x32xf32>
    %cst_94 = arith.constant dense<0.000000e+00> : vector<16xf32>
    %239 = vector.multi_reduction <add>, %236, %cst_94 [1] : vector<16x32xf32> to vector<16xf32>
    %240 = vector.shape_cast %239 : vector<16xf32> to vector<16x1xf32>
    %cst_95 = arith.constant 3.200000e+01 : f32
    %241 = vector.broadcast %cst_95 : f32 to vector<16x1xf32>
    %242 = arith.divf %240, %241 : vector<16x1xf32>
    %243 = vector.broadcast %242 : vector<16x1xf32> to vector<16x32xf32>
    %244 = arith.subf %236, %243 : vector<16x32xf32>
    %245 = arith.mulf %244, %244 : vector<16x32xf32>
    %cst_96 = arith.constant dense<0.000000e+00> : vector<16xf32>
    %246 = vector.multi_reduction <add>, %245, %cst_96 [1] : vector<16x32xf32> to vector<16xf32>
    %247 = vector.shape_cast %246 : vector<16xf32> to vector<16x1xf32>
    %cst_97 = arith.constant 3.200000e+01 : f32
    %248 = vector.broadcast %cst_97 : f32 to vector<16x1xf32>
    %249 = arith.divf %247, %248 : vector<16x1xf32>
    %250 = vector.broadcast %242 : vector<16x1xf32> to vector<16x32xf32>
    %251 = arith.subf %236, %250 : vector<16x32xf32>
    %cst_98 = arith.constant 9.99999996E-13 : f32
    %252 = vector.broadcast %cst_98 : f32 to vector<16x1xf32>
    %253 = arith.addf %249, %252 : vector<16x1xf32>
    %254 = math.rsqrt %253 : vector<16x1xf32>
    %255 = vector.broadcast %254 : vector<16x1xf32> to vector<16x32xf32>
    %256 = arith.mulf %251, %255 : vector<16x32xf32>
    %257 = vector.broadcast %237 : vector<1x32xf32> to vector<16x32xf32>
    %258 = arith.mulf %256, %257 : vector<16x32xf32>
    %259 = vector.broadcast %238 : vector<1x32xf32> to vector<16x32xf32>
    %260 = arith.addf %258, %259 : vector<16x32xf32>
    %261 = arith.truncf %260 : vector<16x32xf32> to vector<16x32xbf16>
    %c1_99 = arith.constant 1 : index
    %c0_100 = arith.constant 0 : index
    %c0_101 = arith.constant 0 : index
    %262 = vector.load %arg4[%c1_99, %c0_100, %c0_101] : memref<2x32x64xbf16, #tpu.memory_space<vmem>>, vector<1x32x64xbf16>
    %263 = vector.shape_cast %262 : vector<1x32x64xbf16> to vector<32x64xbf16>
    %cst_102 = arith.constant dense<0.000000e+00> : vector<16x64xf32>
    %264 = tpu.matmul %261, %263, %cst_102 {dimension_numbers = #tpu.dot_dimension_numbers<[1], [0], [0], [1], [0, 0, 1, 1], [], []>} : vector<16x32xbf16>, vector<32x64xbf16>, vector<16x64xf32> -> vector<16x64xf32>
    %c20 = arith.constant 20 : index
    %c0_103 = arith.constant 0 : index
    %265 = vector.load %arg8[%c20, %c0_103] : memref<24x128xf32, #tpu.memory_space<vmem>>, vector<1x64xf32>
    %266 = vector.broadcast %265 : vector<1x64xf32> to vector<16x64xf32>
    %267 = arith.addf %264, %266 : vector<16x64xf32>
    %268 = arith.mulf %267, %267 : vector<16x64xf32>
    %269 = arith.mulf %267, %268 : vector<16x64xf32>
    %cst_104 = arith.constant 4.471500e-02 : f32
    %270 = vector.broadcast %cst_104 : f32 to vector<16x64xf32>
    %271 = arith.mulf %270, %269 : vector<16x64xf32>
    %272 = arith.addf %267, %271 : vector<16x64xf32>
    %cst_105 = arith.constant 0.797884583 : f32
    %273 = vector.broadcast %cst_105 : f32 to vector<16x64xf32>
    %274 = arith.mulf %273, %272 : vector<16x64xf32>
    %275 = math.tanh %274 : vector<16x64xf32>
    %cst_106 = arith.constant 1.000000e+00 : f32
    %276 = vector.broadcast %cst_106 : f32 to vector<16x64xf32>
    %277 = arith.addf %276, %275 : vector<16x64xf32>
    %cst_107 = arith.constant 5.000000e-01 : f32
    %278 = vector.broadcast %cst_107 : f32 to vector<16x64xf32>
    %279 = arith.mulf %278, %277 : vector<16x64xf32>
    %280 = arith.mulf %267, %279 : vector<16x64xf32>
    %281 = arith.truncf %280 : vector<16x64xf32> to vector<16x64xbf16>
    %c1_108 = arith.constant 1 : index
    %c0_109 = arith.constant 0 : index
    %c0_110 = arith.constant 0 : index
    %282 = vector.load %arg5[%c1_108, %c0_109, %c0_110] : memref<2x64x32xbf16, #tpu.memory_space<vmem>>, vector<1x64x32xbf16>
    %283 = vector.shape_cast %282 : vector<1x64x32xbf16> to vector<64x32xbf16>
    %cst_111 = arith.constant dense<0.000000e+00> : vector<16x32xf32>
    %284 = tpu.matmul %281, %283, %cst_111 {dimension_numbers = #tpu.dot_dimension_numbers<[1], [0], [0], [1], [0, 0, 1, 1], [], []>} : vector<16x64xbf16>, vector<64x32xbf16>, vector<16x32xf32> -> vector<16x32xf32>
    %c21 = arith.constant 21 : index
    %c0_112 = arith.constant 0 : index
    %285 = vector.load %arg8[%c21, %c0_112] : memref<24x128xf32, #tpu.memory_space<vmem>>, vector<1x32xf32>
    %286 = vector.broadcast %285 : vector<1x32xf32> to vector<16x32xf32>
    %287 = arith.addf %284, %286 : vector<16x32xf32>
    %288 = arith.addf %260, %287 : vector<16x32xf32>
    %c22 = arith.constant 22 : index
    %c0_113 = arith.constant 0 : index
    %289 = vector.load %arg8[%c22, %c0_113] : memref<24x128xf32, #tpu.memory_space<vmem>>, vector<1x32xf32>
    %c23 = arith.constant 23 : index
    %c0_114 = arith.constant 0 : index
    %290 = vector.load %arg8[%c23, %c0_114] : memref<24x128xf32, #tpu.memory_space<vmem>>, vector<1x32xf32>
    %cst_115 = arith.constant dense<0.000000e+00> : vector<16xf32>
    %291 = vector.multi_reduction <add>, %288, %cst_115 [1] : vector<16x32xf32> to vector<16xf32>
    %292 = vector.shape_cast %291 : vector<16xf32> to vector<16x1xf32>
    %cst_116 = arith.constant 3.200000e+01 : f32
    %293 = vector.broadcast %cst_116 : f32 to vector<16x1xf32>
    %294 = arith.divf %292, %293 : vector<16x1xf32>
    %295 = vector.broadcast %294 : vector<16x1xf32> to vector<16x32xf32>
    %296 = arith.subf %288, %295 : vector<16x32xf32>
    %297 = arith.mulf %296, %296 : vector<16x32xf32>
    %cst_117 = arith.constant dense<0.000000e+00> : vector<16xf32>
    %298 = vector.multi_reduction <add>, %297, %cst_117 [1] : vector<16x32xf32> to vector<16xf32>
    %299 = vector.shape_cast %298 : vector<16xf32> to vector<16x1xf32>
    %cst_118 = arith.constant 3.200000e+01 : f32
    %300 = vector.broadcast %cst_118 : f32 to vector<16x1xf32>
    %301 = arith.divf %299, %300 : vector<16x1xf32>
    %302 = vector.broadcast %294 : vector<16x1xf32> to vector<16x32xf32>
    %303 = arith.subf %288, %302 : vector<16x32xf32>
    %cst_119 = arith.constant 9.99999996E-13 : f32
    %304 = vector.broadcast %cst_119 : f32 to vector<16x1xf32>
    %305 = arith.addf %301, %304 : vector<16x1xf32>
    %306 = math.rsqrt %305 : vector<16x1xf32>
    %307 = vector.broadcast %306 : vector<16x1xf32> to vector<16x32xf32>
    %308 = arith.mulf %303, %307 : vector<16x32xf32>
    %309 = vector.broadcast %289 : vector<1x32xf32> to vector<16x32xf32>
    %310 = arith.mulf %308, %309 : vector<16x32xf32>
    %311 = vector.broadcast %290 : vector<1x32xf32> to vector<16x32xf32>
    %312 = arith.addf %310, %311 : vector<16x32xf32>
    %cst_120 = arith.constant 0.000000e+00 : f32
    %313 = vector.broadcast %cst_120 : f32 to vector<16x96xf32>
    %314 = tpu.concatenate %312, %313 in 1 : vector<16x32xf32>, vector<16x96xf32> -> vector<16x128xf32>
    %c0_121 = arith.constant 0 : index
    %c0_122 = arith.constant 0 : index
    %315 = vector.load %arg10[%c0_121, %c0_122] : memref<16x128xf32, #tpu.memory_space<vmem>>, vector<16x128xf32>
    tpu.vector_store %arg10[%c0_121, %c0_122], %314 {strides = array<i32>} : memref<16x128xf32, #tpu.memory_space<vmem>>, vector<16x128xf32>,
    %c0_123 = arith.constant 0 : index
    %c0_124 = arith.constant 0 : index
    %316 = tpu.strided_load %arg10[%c0_123, %c0_124] {strides = array<i32: 8, 1>} : memref<16x128xf32, #tpu.memory_space<vmem>>, vector<2x128xf32>
    %317 = vector.extract_strided_slice %316 {offsets = [0, 0], sizes = [2, 32], strides = [1, 1]} : vector<2x128xf32> to vector<2x32xf32>
    %318 = arith.truncf %317 : vector<2x32xf32> to vector<2x32xbf16>
    %c0_125 = arith.constant 0 : index
    %c0_126 = arith.constant 0 : index
    %319 = vector.load %arg6[%c0_125, %c0_126] : memref<32x32xbf16, #tpu.memory_space<vmem>>, vector<32x32xbf16>
    %cst_127 = arith.constant dense<0.000000e+00> : vector<2x32xf32>
    %320 = tpu.matmul %318, %319, %cst_127 {dimension_numbers = #tpu.dot_dimension_numbers<[1], [0], [0], [1], [0, 0, 1, 1], [], []>} : vector<2x32xbf16>, vector<32x32xbf16>, vector<2x32xf32> -> vector<2x32xf32>
    %c2 = arith.constant 2 : index
    %c0_128 = arith.constant 0 : index
    %321 = vector.load %arg8[%c2, %c0_128] : memref<24x128xf32, #tpu.memory_space<vmem>>, vector<1x32xf32>
    %322 = vector.broadcast %321 : vector<1x32xf32> to vector<2x32xf32>
    %323 = arith.addf %320, %322 : vector<2x32xf32>
    %324 = math.tanh %323 : vector<2x32xf32>
    %c5 = arith.constant 5 : index
    %c0_129 = arith.constant 0 : index
    %325 = vector.load %arg8[%c5, %c0_129] : memref<24x128xf32, #tpu.memory_space<vmem>>, vector<1x32xf32>
    %326 = vector.broadcast %325 : vector<1x32xf32> to vector<2x32xf32>
    %327 = arith.subf %324, %326 : vector<2x32xf32>
    %c6 = arith.constant 6 : index
    %c0_130 = arith.constant 0 : index
    %328 = vector.load %arg8[%c6, %c0_130] : memref<24x128xf32, #tpu.memory_space<vmem>>, vector<1x32xf32>
    %cst_131 = arith.constant 9.99999974E-6 : f32
    %329 = vector.broadcast %cst_131 : f32 to vector<1x32xf32>
    %330 = arith.addf %328, %329 : vector<1x32xf32>
    %331 = math.rsqrt %330 : vector<1x32xf32>
    %332 = vector.broadcast %331 : vector<1x32xf32> to vector<2x32xf32>
    %333 = arith.mulf %327, %332 : vector<2x32xf32>
    %c3 = arith.constant 3 : index
    %c0_132 = arith.constant 0 : index
    %334 = vector.load %arg8[%c3, %c0_132] : memref<24x128xf32, #tpu.memory_space<vmem>>, vector<1x32xf32>
    %335 = vector.broadcast %334 : vector<1x32xf32> to vector<2x32xf32>
    %336 = arith.mulf %333, %335 : vector<2x32xf32>
    %c4 = arith.constant 4 : index
    %c0_133 = arith.constant 0 : index
    %337 = vector.load %arg8[%c4, %c0_133] : memref<24x128xf32, #tpu.memory_space<vmem>>, vector<1x32xf32>
    %338 = vector.broadcast %337 : vector<1x32xf32> to vector<2x32xf32>
    %339 = arith.addf %336, %338 : vector<2x32xf32>
    %340 = arith.truncf %339 : vector<2x32xf32> to vector<2x32xbf16>
    %c0_134 = arith.constant 0 : index
    %c0_135 = arith.constant 0 : index
    %341 = vector.load %arg7[%c0_134, %c0_135] : memref<32x128xbf16, #tpu.memory_space<vmem>>, vector<32x128xbf16>
    %cst_136 = arith.constant dense<0.000000e+00> : vector<2x128xf32>
    %342 = tpu.matmul %340, %341, %cst_136 {dimension_numbers = #tpu.dot_dimension_numbers<[1], [0], [0], [1], [0, 0, 1, 1], [], []>} : vector<2x32xbf16>, vector<32x128xbf16>, vector<2x128xf32> -> vector<2x128xf32>
    %c7 = arith.constant 7 : index
    %c0_137 = arith.constant 0 : index
    %343 = vector.load %arg8[%c7, %c0_137] : memref<24x128xf32, #tpu.memory_space<vmem>>, vector<1x128xf32>
    %344 = vector.broadcast %343 : vector<1x128xf32> to vector<2x128xf32>
    %345 = arith.addf %342, %344 : vector<2x128xf32>
    %346 = vector.extract_strided_slice %345 {offsets = [0, 0], sizes = [2, 6], strides = [1, 1]} : vector<2x128xf32> to vector<2x6xf32>
    %c0_138 = arith.constant 0 : index
    %c0_139 = arith.constant 0 : index
    %347 = vector.load %arg9[%c0_138, %c0_139] : memref<2x6xf32, #tpu.memory_space<vmem>>, vector<2x6xf32>
    %cst_140 = arith.constant 0.000000e+00 : f32
    %348 = vector.broadcast %cst_140 : f32 to vector<2x6xf32>
    %349 = arith.maximumf %346, %348 : vector<2x6xf32>
    %350 = arith.mulf %346, %347 : vector<2x6xf32>
    %351 = arith.subf %349, %350 : vector<2x6xf32>
    %352 = math.absf %346 : vector<2x6xf32>
    %cst_141 = arith.constant 0.000000e+00 : f32
    %353 = vector.broadcast %cst_141 : f32 to vector<2x6xf32>
    %354 = arith.subf %353, %352 : vector<2x6xf32>
    %355 = math.exp %354 : vector<2x6xf32>
    %356 = math.log1p %355 : vector<2x6xf32>
    %357 = arith.addf %351, %356 : vector<2x6xf32>
    %358 = vector.shape_cast %357 : vector<2x6xf32> to vector<1x2x6xf32>
    %cst_142 = arith.constant dense<0.000000e+00> : vector<1xf32>
    %359 = vector.multi_reduction <add>, %358, %cst_142 [1, 2] : vector<1x2x6xf32> to vector<1xf32>
    %360 = vector.shape_cast %359 : vector<1xf32> to vector<1x1x1xf32>
    %361 = vector.extract %360[0, 0, 0] : f32 from vector<1x1x1xf32>
    %362 = vector.broadcast %361 : f32 to vector<1x1xf32>
    %cst_143 = arith.constant 1.200000e+01 : f32
    %363 = vector.broadcast %cst_143 : f32 to vector<1x1xf32>
    %364 = arith.divf %362, %363 : vector<1x1xf32>
    %365 = tpu.iota {dimensions = array<i32: 1>} : vector<2x128xi32>
    %c6_i32 = arith.constant 6 : i32
    %366 = vector.broadcast %c6_i32 : i32 to vector<2x128xi32>
    %367 = arith.cmpi eq, %365, %366 : vector<2x128xi32>
    %368 = vector.shape_cast %364 : vector<1x1xf32> to vector<1x1xf32>
    %369 = vector.broadcast %368 : vector<1x1xf32> to vector<2x128xf32>
    %370 = arith.select %367, %369, %345 : vector<2x128xi1>, vector<2x128xf32>
    %c0_144 = arith.constant 0 : index
    %c0_145 = arith.constant 0 : index
    %371 = vector.load %arg11[%c0_144, %c0_145] : memref<2x128xf32, #tpu.memory_space<vmem>>, vector<2x128xf32>
    tpu.vector_store %arg11[%c0_144, %c0_145], %370 {strides = array<i32>} : memref<2x128xf32, #tpu.memory_space<vmem>>, vector<2x128xf32>,
    return
  }
}

</mosaic_0001>

<bundles_post_ra>
// kernel: multi_label_bert_forward.1
= control target key start
LH: loop header
LB: loop body
LE: loop exit
PB: predicated region body
PF: predicated region fallthrough
CT: control target
= control target key end

     0   :  { %vm42_vm0 = vcmask 261120   ;;  %v1715_v4 = vmov 32.0   ;;  %s1716_s30 = smov 80   ;;  %s1717_s12 = smov 96   ;;  %vm148_vm8 = vcmask 130048   ;;  %vm200_vm9 = vcmask 64512   ;;  %s2161_s0 = inlined_call_operand.vmem [shape: f32[16,32], index: 0, kind: input, shape index: {}]   ;;  %s2162_s8 = inlined_call_operand.vmem [shape: f32[24,128], index: 8, kind: input, shape index: {}]   ;;  %s2163_s2 = inlined_call_operand.vmem [shape: bf16[2,32,96], index: 2, kind: input, shape index: {}]   ;;  %s2164_s1 = inlined_call_operand.vmem [shape: f32[2,8], index: 1, kind: input, shape index: {}]   ;;  %s2165_s3 = inlined_call_operand.vmem [shape: bf16[2,32,32], index: 3, kind: input, shape index: {}]   ;;  %s2166_s4 = inlined_call_operand.vmem [shape: bf16[2,32,64], index: 4, kind: input, shape index: {}]   ;;  %s2167_s5 = inlined_call_operand.vmem [shape: bf16[2,64,32], index: 5, kind: input, shape index: {}]   ;;  %s2168_s6 = inlined_call_operand.vmem [shape: bf16[32,32], index: 6, kind: input, shape index: {}]   ;;  %s2169_s10 = inlined_call_operand.vmem [shape: f32[16,128], index: 10, kind: output, shape index: {0}]   ;;  %s2170_s7 = inlined_call_operand.vmem [shape: bf16[32,128], index: 7, kind: input, shape index: {}]   ;;  %s2171_s9 = inlined_call_operand.vmem [shape: f32[2,6], index: 9, kind: input, shape index: {}]   ;;  %s2172_s11 = inlined_call_operand.vmem [shape: f32[2,128], index: 11, kind: output, shape index: {1}]  }
   0x1   :  { %v38_v0 = vld [vmem:[%s2161_s0] sm:$0xff]  ;;  %v39_v2 = vld [vmem:[%s2161_s0 + $0x8] sm:$0xff]  ;;  %1643 = vrcp.f32 %v1715_v4  ;;  %s1718_s13 = smov 112   ;;  %s1720_s16 = smov 48   ;;  %vm256_vm10 = vcmask 1043456  }
   0x2   :  { %v43_v1 = vsel %vm42_vm0, %v38_v0, 0.0  ;;  %v46_v3 = vsel %vm42_vm0, %v39_v2, 0.0  ;;  %v1587_v21 = vld [vmem:[%s2163_s2 + $0x8] sm:$0xff]  ;;  %v1586_v23 = vld [vmem:[%s2163_s2] sm:$0xff]  ;;  %s1721_s17 = smov 16  }
   0x3   :  { %44 = vadd.xlane.f32.xlu0 %v43_v1  ;;  %133 = vmatpush.bf16.msra.mxu0 %v1587_v21  ;;  %v1620_v42 = vld [vmem:[%s2162_s8] ss:$0 sm:$0xff]  ;;  %v1621_v47 = vld [vmem:[%s2162_s8 + $0x1] ss:$0 sm:$0xff]  ;;  %v1622_v52 = vld [vmem:[%s2162_s8 + $0x8] ss:$0 sm:$0xff] }
   0x7   :  { %v1644_v5 = vpop.eup %1643  ;;  %134 = vmatpush.bf16.msra.mxu0 %v1586_v23 }
   0x8   :  { %v50_v6 = vmul.f32 32.0, %v1644_v5  ;;  %vm54_vm1 = vweird.f32 %v1644_v5 }
   0xa   :  { %v51_v7 = vsub.f32 1.0, %v50_v6 }
   0xb   :  { %47 = vadd.xlane.f32.xlu0 %v46_v3 }
   0xc   :  { %v52_v8 = vmul.f32 %v1644_v5, %v51_v7 }
   0xe   :  { %v53_v9 = vadd.f32 %v1644_v5, %v52_v8 }
  0x10   :  { %v1791_v10 = vsel %vm54_vm1, %v1644_v5, %v53_v9  ;;  %v100_v9 = vld [vmem:[%s2164_s1] sm:$0x3]  ;;  %s1719_s1 = smov 64  }
  0x76   :  { %v45_v11 = vpop.xlane.xlu0 %44 }
  0x77   :  { %v56_v12 = vmul.f32 %v1791_v10, %v45_v11  ;;  %v101_v11 = vsub.f32 1.0, %v100_v9 }
  0x79   :  { %v58_v13 = vsub.f32 %v38_v0, %v56_v12  ;;  %v102_v12 = vmul.f32 -1e+09, %v101_v11 }
  0x7b   :  { %v60_v14 = vmul.f32 %v58_v13, %v58_v13 }
  0x7d   :  { %v62_v15 = vsel %vm42_vm0, %v60_v14, 0.0 }
  0x7e   :  { %63 = vadd.xlane.f32.xlu1 %v62_v15  ;;  %v48_v16 = vpop.xlane.xlu0 %47 }
  0x7f   :  { %v57_v17 = vmul.f32 %v1791_v10, %v48_v16 }
  0x81   :  { %v59_v18 = vsub.f32 %v39_v2, %v57_v17 }
  0x83   :  { %v61_v19 = vmul.f32 %v59_v18, %v59_v18 }
  0x85   :  { %v65_v20 = vsel %vm42_vm0, %v61_v19, 0.0  ;;  %v104_v19 = vrot.slane %v102_v12, 1 }
  0x86   :  { %66 = vadd.xlane.f32.xlu1 %v65_v20 }
  0x87   :  { %v1852_v20 = vperm.slane %v104_v19, 0 }
  0xf1   :  { %v64_v22 = vpop.xlane.xlu1 %63 }
  0xf2   :  { %v68_v24 = vmul.f32 %v64_v22, %v1791_v10 }
  0xf4   :  { %v70_v25 = vadd.f32 1e-12, %v68_v24 }
  0xf6   :  { %1645 = vrsqrt.f32 %v70_v25  ;;  %vm78_vm3 = vweird.f32 %v70_v25 }
  0xf9   :  { %v67_v26 = vpop.xlane.xlu1 %66 }
  0xfa   :  { %v69_v27 = vmul.f32 %v67_v26, %v1791_v10 }
  0xfc   :  { %v1646_v28 = vpop.eup %1645  ;;  %v71_v29 = vadd.f32 1e-12, %v69_v27 }
  0xfd   :  { %v73_v30 = vmul.f32 %v1646_v28, %v70_v25  ;;  %vm79_vm2 = vweird.f32 %v1646_v28 }
  0xfe   :  { %1647 = vrsqrt.f32 %v71_v29  ;;  %vm80_vm4 = vmor %vm78_vm3, %vm79_vm2  ;;  %vm88_vm6 = vweird.f32 %v71_v29 }
  0xff   :  { %v74_v31 = vmul.f32 %v1646_v28, %v73_v30 }
 0x101   :  { %v75_v32 = vmul.f32 0.5, %v74_v31 }
 0x103   :  { %v76_v33 = vsub.f32 1.5, %v75_v32 }
 0x104   :  { %v1648_v34 = vpop.eup %1647 }
 0x105   :  { %v77_v35 = vmul.f32 %v1646_v28, %v76_v33  ;;  %v83_v36 = vmul.f32 %v1648_v34, %v71_v29  ;;  %vm89_vm5 = vweird.f32 %v1648_v34 }
 0x106   :  { %vm90_vm7 = vmor %vm88_vm6, %vm89_vm5 }
 0x107   :  { %v84_v37 = vmul.f32 %v1648_v34, %v83_v36  ;;  %v81_v38 = vsel %vm80_vm4, %v1646_v28, %v77_v35 }
 0x108   :  { %v92_v41 = vmul.f32 %v81_v38, %v58_v13  ;;  %v1848_v13 = vperm.slane %v102_v12, 0 }
 0x109   :  { %v85_v39 = vmul.f32 0.5, %v84_v37 }
 0x10a   :  { %v95_v46 = vmul.f32 %v1620_v42, %v92_v41 }
 0x10b   :  { %v86_v40 = vsub.f32 1.5, %v85_v39 }
 0x10c   :  { %v1811_v49 = vadd.f32 %v1621_v47, %v95_v46 }
 0x10d   :  { %v87_v43 = vmul.f32 %v1648_v34, %v86_v40 }
 0x10f   :  { %v91_v44 = vsel %vm90_vm7, %v1648_v34, %v87_v43 }
 0x110   :  { %v93_v45 = vmul.f32 %v91_v44, %v59_v18 }
 0x112   :  { %v96_v48 = vmul.f32 %v1620_v42, %v93_v45 }
 0x114   :  { %v1813_v50 = vadd.f32 %v1621_v47, %v96_v48 }
 0x116   :  { %v105_v51 = vpack.c.bf16 %v1813_v50, %v1811_v49 }
 0x118   :  { %1452 = vmatmul.msk.bf16.vlgmr.msra.gmra.mxu0 %vm42_vm0, %v105_v51 }
 0x195   :  { %v136_v53 = vpop.f32.mrf.mxu0 }
 0x196   :  { %v137_v54 = vadd.f32 %v1622_v52, %v136_v53 }
 0x198   :  { %v141_v55 = vpack.c.bf16 %v137_v54, %v137_v54 }
 0x19a   :  { %v144_v56 = vunpack.c.l.b16 %v141_v55 }
 0x19c   :  { %v1821_v57 = vpack.c.b16 %v144_v56, %v144_v56 }
 0x19d   :  { %v138_v58 = vpop.f32.mrf.mxu0 }
 0x19e   :  { %v139_v59 = vadd.f32 %v1622_v52, %v138_v58  ;;  %298 = vrot.lane.b32.xlu0 %v1821_v57, %s1716_s30  ;;  %146 = vrot.lane.b32.xlu2 %v1821_v57, %s1717_s12 }
 0x1a0   :  { %v142_v60 = vpack.c.bf16 %v139_v59, %v139_v59 }
 0x1a2   :  { %v169_v61 = vunpack.c.l.b16 %v142_v60 }
 0x1a4   :  { %v1827_v62 = vpack.c.b16 %v169_v61, %v169_v61 }
 0x1a6   :  { %321 = vrot.lane.b32.xlu1 %v1827_v62, %s1716_s30  ;;  %171 = vrot.lane.b32.xlu2 %v1827_v62, %s1717_s12 }
 0x1ae   :  { %296 = vrot.lane.b32.xlu2 %v1821_v57, %s1718_s13 }
 0x1b6   :  { %319 = vrot.lane.b32.xlu2 %v1827_v62, %s1718_s13 }
 0x1f8   :  { %v147_v63 = vpop.permute.xlu2 %146 }
 0x1f9   :  { %v153_v0 = vsel %vm148_vm8, %v147_v63, 0 }
 0x1fa   :  { %162 = vmatpush.bf16.xpose.msra.mxu1 %v153_v0 }
 0x200   :  { %v172_v1 = vpop.permute.xlu2 %171 }
 0x201   :  { %1453 = vmatmul.msk.bf16.vlgmr.msra.gmra.mxu1 %vm148_vm8, %v141_v55  ;;  %v177_v2 = vsel %vm148_vm8, %v172_v1, 0 }
 0x202   :  { %186 = vmatpush.bf16.xpose.msra.mxu2 %v177_v2 }
 0x208   :  { %v297_v5 = vpop.permute.xlu2 %296 }
 0x209   :  { %1454 = vmatmul.msk.bf16.vlgmr.msra.gmra.mxu2 %vm148_vm8, %v142_v60 }
 0x210   :  { %v299_v3 = vpop.permute.xlu0 %298  ;;  %v320_v8 = vpop.permute.xlu2 %319 }
 0x211   :  { %v304_v4 = vsel %vm148_vm8, %v299_v3, 0 }
 0x212   :  { %313 = vmatpush.bf16.xpose.msrb.mxu0 %v304_v4 }
 0x218   :  { %v322_v6 = vpop.permute.xlu1 %321 }
 0x219   :  { %1457 = vmatmul.msk.bf16.vlgmr.msrb.gmra.mxu0 %vm148_vm8, %v297_v5  ;;  %v327_v7 = vsel %vm148_vm8, %v322_v6, 0 }
 0x21a   :  { %336 = vmatpush.bf16.xpose.msrb.mxu1 %v327_v7 }
 0x221   :  { %1458 = vmatmul.msk.bf16.vlgmr.msrb.gmra.mxu1 %vm148_vm8, %v320_v8 }
 0x27e   :  { %v164_v14 = vpop.f32.mrf.mxu1 }
 0x27f   :  { %v192_v15 = vmul.f32 0.25, %v164_v14 }
 0x281   :  { %v198_v16 = vadd.f32 %v1848_v13, %v192_v15 }
 0x283   :  { %v201_v17 = vsel %vm200_vm9, %v198_v16, -inf }
 0x284   :  { %202 = vmax.xlane.f32.xlu2 %v201_v17 }
 0x286   :  { %v166_v18 = vpop.f32.mrf.mxu1 }
 0x28c   :  { %v188_v21 = vpop.f32.mrf.mxu2 }
 0x28d   :  { %v193_v22 = vmul.f32 0.25, %v188_v21 }
 0x28f   :  { %v199_v23 = vadd.f32 %v1852_v20, %v193_v22 }
 0x291   :  { %v204_v24 = vsel %vm200_vm9, %v199_v23, -inf }
 0x292   :  { %205 = vmax.xlane.f32.xlu0 %v204_v24 }
 0x294   :  { %v190_v25 = vpop.f32.mrf.mxu2 }
 0x296   :  { %v315_v26 = vpop.f32.mrf.mxu0 }
 0x297   :  { %v342_v27 = vmul.f32 0.25, %v315_v26 }
 0x299   :  { %v344_v28 = vadd.f32 %v342_v27, %v1848_v13 }
 0x29b   :  { %v346_v29 = vsel %vm200_vm9, %v344_v28, -inf }
 0x29c   :  { %347 = vmax.xlane.f32.xlu1 %v346_v29 }
 0x29e   :  { %v317_v30 = vpop.f32.mrf.mxu0  ;;  %v338_v31 = vpop.f32.mrf.mxu1 }
 0x29f   :  { %v343_v32 = vmul.f32 0.25, %v338_v31 }
 0x2a1   :  { %v345_v33 = vadd.f32 %v343_v32, %v1852_v20 }
 0x2a3   :  { %v349_v34 = vsel %vm200_vm9, %v345_v33, -inf }
 0x2a4   :  { %350 = vmax.xlane.f32.xlu2 %v349_v34 }
 0x2a6   :  { %v340_v35 = vpop.f32.mrf.mxu1 }
 0x2b5   :  { %251 = vrot.lane.b32.xlu1 %v1821_v57, %s1719_s1 }
 0x2bd   :  { %417 = vrot.lane.b32.xlu1 %v1827_v62, %s1720_s16 }
 0x2f7   :  { %v203_v36 = vpop.xlane.xlu2 %202 }
 0x2f8   :  { %v207_v37 = vsub.f32 %v198_v16, %v203_v36 }
 0x2fa   :  { %v209_v38 = vmul.f32 1.442695, %v207_v37 }
 0x2fc   :  { %1649 = vpow2.f32 %v209_v38 }
 0x302   :  { %v1650_v39 = vpop.eup %1649 }
 0x303   :  { %v213_v40 = vsel %vm200_vm9, %v1650_v39, 0.0 }
 0x304   :  { %214 = vadd.xlane.f32.xlu0 %v213_v40 }
 0x305   :  { %v206_v41 = vpop.xlane.xlu0 %205 }
 0x306   :  { %v208_v42 = vsub.f32 %v199_v23, %v206_v41 }
 0x308   :  { %v211_v43 = vmul.f32 1.442695, %v208_v42 }
 0x30a   :  { %1651 = vpow2.f32 %v211_v43 }
 0x30f   :  { %v348_v44 = vpop.xlane.xlu1 %347 }
 0x310   :  { %v1865_v45 = vpop.eup %1651  ;;  %v352_v46 = vsub.f32 %v344_v28, %v348_v44 }
 0x311   :  { %v216_v47 = vsel %vm200_vm9, %v1865_v45, 0.0 }
 0x312   :  { %v354_v48 = vmul.f32 1.442695, %v352_v46  ;;  %217 = vadd.xlane.f32.xlu2 %v216_v47 }
 0x314   :  { %1653 = vpow2.f32 %v354_v48 }
 0x317   :  { %v351_v51 = vpop.xlane.xlu2 %350 }
 0x318   :  { %v353_v52 = vsub.f32 %v345_v33, %v351_v51 }
 0x31a   :  { %v1869_v53 = vpop.eup %1653  ;;  %v356_v54 = vmul.f32 1.442695, %v353_v52 }
 0x31b   :  { %v358_v55 = vsel %vm200_vm9, %v1869_v53, 0.0 }
 0x31c   :  { %1655 = vpow2.f32 %v356_v54  ;;  %359 = vadd.xlane.f32.xlu0 %v358_v55 }
 0x322   :  { %v1873_v56 = vpop.eup %1655 }
 0x323   :  { %v361_v58 = vsel %vm200_vm9, %v1873_v56, 0.0 }
 0x324   :  { %362 = vadd.xlane.f32.xlu2 %v361_v58 }
 0x327   :  { %v252_v59 = vpop.permute.xlu1 %251 }
 0x328   :  { %v258_v60 = vsel %vm256_vm10, %v252_v59, 0 }
 0x329   :  { %267 = vmatpush.bf16.msra.mxu3 %v258_v60 }
 0x330   :  { %273 = vrot.lane.b32.xlu0 %v1827_v62, %s1719_s1 }
 0x33c   :  { %396 = vrot.lane.b32.xlu2 %v1821_v57, %s1720_s16 }
 0x377   :  { %v215_v61 = vpop.xlane.xlu0 %214 }
 0x378   :  { %1657 = vrcp.f32 %v215_v61  ;;  %v230_v2 = vand.u32 2147483648, %v215_v61  ;;  %v228_v4 = vand.u32 2147483647, %v215_v61  ;;  %vm224_vm12 = vweird.f32 %v215_v61 }
 0x37a   :  { %v231_v7 = vor.u32 1.1754944e-38, %v230_v2  ;;  %vm229_vm14 = vcmp.eq.f32.partialorder %v228_v4, 8.507059e+37 }
 0x37e   :  { %v1658_v63 = vpop.eup %1657 }
 0x37f   :  { %v220_v0 = vmul.f32 %v1658_v63, %v215_v61  ;;  %vm225_vm11 = vweird.f32 %v1658_v63 }
 0x380   :  { %vm226_vm13 = vmor %vm224_vm12, %vm225_vm11 }
 0x381   :  { %v221_v1 = vsub.f32 1.0, %v220_v0 }
 0x383   :  { %v222_v3 = vmul.f32 %v1658_v63, %v221_v1 }
 0x385   :  { %v218_v5 = vpop.xlane.xlu2 %217  ;;  %v223_v6 = vadd.f32 %v1658_v63, %v222_v3 }
 0x386   :  { %1659 = vrcp.f32 %v218_v5  ;;  %v245_v22 = vand.u32 2147483648, %v218_v5  ;;  %vm239_vm1 = vweird.f32 %v218_v5  ;;  %v243_v23 = vand.u32 2147483647, %v218_v5 }
 0x387   :  { %v227_v8 = vsel %vm226_vm13, %v1658_v63, %v223_v6  ;;  %v1588_v6 = vld [vmem:[%s2165_s3] sm:$0xff] }
 0x388   :  { %v232_v62 = vsel %vm229_vm14, %v231_v7, %v227_v8  ;;  %v246_v29 = vor.u32 1.1754944e-38, %v245_v22  ;;  %vm244_vm4 = vcmp.eq.f32.partialorder %v243_v23, 8.507059e+37 }
 0x389   :  { %v233_v9 = vmul.f32 %v1650_v39, %v232_v62  ;;  %v418_v39 = vpop.permute.xlu1 %417 }
 0x38a   :  { %v423_v48 = vsel %vm256_vm10, %v418_v39, 0 }
 0x38b   :  { %v249_v57 = vpack.c.bf16 %v233_v9, %v233_v9 }
 0x38c   :  { %v1660_v11 = vpop.eup %1659 }
 0x38d   :  { %v235_v12 = vmul.f32 %v1660_v11, %v218_v5  ;;  %1455 = vmatmul.msk.bf16.vlgmr.msra.gmra.mxu3 %vm200_vm9, %v249_v57  ;;  %vm240_vm15 = vweird.f32 %v1660_v11  ;;  %v1589_v5 = vld [vmem:[%s2165_s3 + $0x8] sm:$0xff] }
 0x38e   :  { %vm241_vm2 = vmor %vm239_vm1, %vm240_vm15  ;;  %479 = vmatpush.bf16.msra.mxu0 %v1589_v5  ;;  %vm446_vm15 = vcmask 261248   ;;  %v1592_v5 = vld [vmem:[%s2167_s5] sm:$0xff] }
 0x38f   :  { %v236_v14 = vsub.f32 1.0, %v235_v12  ;;  %v360_v15 = vpop.xlane.xlu0 %359 }
 0x390   :  { %1661 = vrcp.f32 %v360_v15  ;;  %v375_v25 = vand.u32 2147483648, %v360_v15  ;;  %v373_v27 = vand.u32 2147483647, %v360_v15  ;;  %vm369_vm5 = vweird.f32 %v360_v15 }
 0x391   :  { %v237_v16 = vmul.f32 %v1660_v11, %v236_v14 }
 0x392   :  { %v376_v32 = vor.u32 1.1754944e-38, %v375_v25  ;;  %vm374_vm7 = vcmp.eq.f32.partialorder %v373_v27, 8.507059e+37  ;;  %480 = vmatpush.bf16.msra.mxu0 %v1588_v6 }
 0x393   :  { %v238_v18 = vadd.f32 %v1660_v11, %v237_v16 }
 0x395   :  { %v242_v28 = vsel %vm241_vm2, %v1660_v11, %v238_v18  ;;  %v1623_v11 = vld [vmem:[%s2162_s8 + $0x9] ss:$0 sm:$0xff] }
 0x396   :  { %v1662_v17 = vpop.eup %1661  ;;  %v247_v33 = vsel %vm244_vm4, %v246_v29, %v242_v28 }
 0x397   :  { %v365_v19 = vmul.f32 %v1662_v17, %v360_v15  ;;  %v363_v21 = vpop.xlane.xlu2 %362  ;;  %vm370_vm3 = vweird.f32 %v1662_v17  ;;  %v248_v42 = vmul.f32 %v1865_v45, %v247_v33  ;;  %v1590_v33 = vld [vmem:[%s2166_s4] sm:$0xff] }
 0x398   :  { %1663 = vrcp.f32 %v363_v21  ;;  %vm371_vm6 = vmor %vm369_vm5, %vm370_vm3  ;;  %v390_v54 = vand.u32 2147483648, %v363_v21  ;;  %vm384_vm12 = vweird.f32 %v363_v21 }
 0x399   :  { %v366_v24 = vsub.f32 1.0, %v365_v19  ;;  %v250_v51 = vpack.c.bf16 %v248_v42, %v248_v42 }
 0x39a   :  { %v391_v55 = vor.u32 1.1754944e-38, %v390_v54  ;;  %v1624_v54 = vld [vmem:[%s2162_s8 + $0xa] ss:$0 sm:$0xff] }
 0x39b   :  { %v367_v26 = vmul.f32 %v1662_v17, %v366_v24 }
 0x39d   :  { %v368_v30 = vadd.f32 %v1662_v17, %v367_v26 }
 0x39e   :  { %v1664_v31 = vpop.eup %1663 }
 0x39f   :  { %v380_v34 = vmul.f32 %v1664_v31, %v363_v21  ;;  %v397_v35 = vpop.permute.xlu2 %396  ;;  %v372_v36 = vsel %vm371_vm6, %v1662_v17, %v368_v30  ;;  %vm385_vm11 = vweird.f32 %v1664_v31 }
 0x3a0   :  { %v402_v37 = vsel %vm256_vm10, %v397_v35, 0  ;;  %v377_v38 = vsel %vm374_vm7, %v376_v32, %v372_v36  ;;  %vm386_vm13 = vmor %vm384_vm12, %vm385_vm11  ;;  %vm630_vm7 = vcmask 523264  }
 0x3a1   :  { %v381_v40 = vsub.f32 1.0, %v380_v34  ;;  %411 = vmatpush.bf16.msrb.mxu2 %v402_v37  ;;  %v378_v41 = vmul.f32 %v1869_v53, %v377_v38  ;;  %v388_v53 = vand.u32 2147483647, %v363_v21 }
 0x3a2   :  { %v274_v43 = vpop.permute.xlu0 %273 }
 0x3a3   :  { %v382_v44 = vmul.f32 %v1664_v31, %v381_v40  ;;  %v279_v46 = vsel %vm256_vm10, %v274_v43, 0  ;;  %v394_v47 = vpack.c.bf16 %v378_v41, %v378_v41  ;;  %vm389_vm14 = vcmp.eq.f32.partialorder %v388_v53, 8.507059e+37 }
 0x3a4   :  { %288 = vmatpush.bf16.msrb.mxu3 %v279_v46 }
 0x3a5   :  { %1459 = vmatmul.msk.bf16.vlgmr.msrb.gmra.mxu2 %vm200_vm9, %v394_v47  ;;  %v383_v52 = vadd.f32 %v1664_v31, %v382_v44 }
 0x3a7   :  { %1456 = vmatmul.msk.bf16.vlgmr.msrb.gmra.mxu3 %vm200_vm9, %v250_v51  ;;  %v387_v45 = vsel %vm386_vm13, %v1664_v31, %v383_v52 }
 0x3a8   :  { %432 = vmatpush.bf16.msra.mxu3 %v423_v48  ;;  %v392_v58 = vsel %vm389_vm14, %v391_v55, %v387_v45 }
 0x3a9   :  { %v393_v59 = vmul.f32 %v1873_v56, %v392_v58  ;;  %v1625_v58 = vld [vmem:[%s2162_s8 + $0xb] ss:$0 sm:$0xff] }
 0x3ab   :  { %v395_v60 = vpack.c.bf16 %v393_v59, %v393_v59 }
 0x3b7   :  { %1460 = vmatmul.msk.bf16.vlgmr.msra.gmra.mxu3 %vm200_vm9, %v395_v60 }
 0x410   :  { %v269_v61 = vpop.f32.mrf.mxu3 }
 0x411   :  { %294 = vst.msk [vmem:[#allocation2] sm:$0xff] %vm148_vm8, %v269_v61 }
 0x418   :  { %v271_v63 = vpop.f32.mrf.mxu3 }
 0x428   :  { %v413_v0 = vpop.f32.mrf.mxu2 }
 0x429   :  { %440 = vrot.lane.b32.xlu0 %v413_v0, %s1721_s17 }
 0x42a   :  { %v290_v1 = vpop.f32.mrf.mxu3 }
 0x42b   :  { %295 = vst.msk [vmem:[#allocation2 + $0x8] sm:$0xff] %vm148_vm8, %v290_v1 }
 0x430   :  { %v415_v2 = vpop.f32.mrf.mxu2 }
 0x431   :  { %v1595_v2 = vld [vmem:[%s2167_s5 + $0x18] sm:$0xff] }
 0x432   :  { %v292_v3 = vpop.f32.mrf.mxu3  ;;  %638 = vmatpush.bf16.msra.mxu2 %v1595_v2 }
 0x433   :  { %v1594_v3 = vld [vmem:[%s2167_s5 + $0x10] sm:$0xff] }
 0x436   :  { %639 = vmatpush.bf16.msra.mxu2 %v1594_v3 }
 0x43a   :  { %v434_v4 = vpop.f32.mrf.mxu3 }
 0x43b   :  { %442 = vrot.lane.b32.xlu1 %v434_v4, %s1721_s17  ;;  %v1593_v4 = vld [vmem:[%s2167_s5 + $0x8] sm:$0xff] }
 0x43c   :  { %640 = vmatpush.bf16.msra.mxu2 %v1593_v4 }
 0x440   :  { %641 = vmatpush.bf16.msra.mxu2 %v1592_v5 }
 0x442   :  { %v436_v56 = vpop.f32.mrf.mxu3 }
 0x443   :  { %v1626_v56 = vld [vmem:[%s2162_s8 + $0xc] ss:$0 sm:$0xff] }
 0x49b   :  { %v441_v7 = vpop.permute.xlu0 %440 }
 0x49c   :  { %447 = vst.msk [vmem:[#allocation2] sm:$0xff] %vm446_vm15, %v441_v7 }
 0x4a3   :  { %v449_v62 = vld [vmem:[#allocation2] sm:$0xff] }
 0x4ad   :  { %v443_v8 = vpop.permute.xlu1 %442 }
 0x4ae   :  { %448 = vst.msk [vmem:[#allocation2 + $0x8] sm:$0xff] %vm446_vm15, %v443_v8 }
 0x4b5   :  { %v450_v9 = vld [vmem:[#allocation2 + $0x8] sm:$0xff] }
 0x4b6   :  { %v451_v57 = vpack.c.bf16 %v450_v9, %v449_v62 }
 0x4b8   :  { %1469 = vmatmul.msk.bf16.vlgmr.msra.gmra.mxu0 %vm42_vm0, %v451_v57 }
 0x535   :  { %v482_v12 = vpop.f32.mrf.mxu0 }
 0x536   :  { %v483_v14 = vadd.f32 %v1623_v11, %v482_v12 }
 0x538   :  { %v487_v15 = vadd.f32 %v483_v14, %v1811_v49 }
 0x53a   :  { %v491_v16 = vsel %vm42_vm0, %v487_v15, 0.0 }
 0x53b   :  { %492 = vadd.xlane.f32.xlu2 %v491_v16 }
 0x53d   :  { %v484_v17 = vpop.f32.mrf.mxu0 }
 0x53e   :  { %v485_v18 = vadd.f32 %v1623_v11, %v484_v17 }
 0x540   :  { %v488_v19 = vadd.f32 %v485_v18, %v1813_v50  ;;  %v1591_v50 = vld [vmem:[%s2166_s4 + $0x8] sm:$0xff] }
 0x541   :  { %569 = vmatpush.bf16.msra.mxu1 %v1591_v50 }
 0x542   :  { %v494_v21 = vsel %vm42_vm0, %v488_v19, 0.0 }
 0x543   :  { %495 = vadd.xlane.f32.xlu0 %v494_v21 }
 0x545   :  { %570 = vmatpush.bf16.msra.mxu1 %v1590_v33 }
 0x5ae   :  { %v493_v22 = vpop.xlane.xlu2 %492 }
 0x5af   :  { %v497_v23 = vmul.f32 %v493_v22, %v1791_v10 }
 0x5b1   :  { %v499_v24 = vsub.f32 %v487_v15, %v497_v23 }
 0x5b3   :  { %v501_v25 = vmul.f32 %v499_v24, %v499_v24 }
 0x5b5   :  { %v503_v26 = vsel %vm42_vm0, %v501_v25, 0.0 }
 0x5b6   :  { %v496_v27 = vpop.xlane.xlu0 %495  ;;  %504 = vadd.xlane.f32.xlu1 %v503_v26 }
 0x5b7   :  { %v498_v49 = vmul.f32 %v496_v27, %v1791_v10 }
 0x5b9   :  { %v500_v28 = vsub.f32 %v488_v19, %v498_v49 }
 0x5bb   :  { %v502_v29 = vmul.f32 %v500_v28, %v500_v28 }
 0x5bd   :  { %v506_v30 = vsel %vm42_vm0, %v502_v29, 0.0  ;;  %v1627_v29 = vld [vmem:[%s2162_s8 + $0xd] ss:$0 sm:$0xff] }
 0x5be   :  { %507 = vadd.xlane.f32.xlu2 %v506_v30 }
 0x629   :  { %v505_v31 = vpop.xlane.xlu1 %504 }
 0x62a   :  { %v509_v32 = vmul.f32 %v505_v31, %v1791_v10 }
 0x62c   :  { %v511_v34 = vadd.f32 1e-12, %v509_v32 }
 0x62e   :  { %1665 = vrsqrt.f32 %v511_v34  ;;  %vm519_vm2 = vweird.f32 %v511_v34 }
 0x631   :  { %v508_v35 = vpop.xlane.xlu2 %507 }
 0x632   :  { %v510_v36 = vmul.f32 %v508_v35, %v1791_v10 }
 0x634   :  { %v1666_v37 = vpop.eup %1665  ;;  %v512_v38 = vadd.f32 1e-12, %v510_v36 }
 0x635   :  { %v514_v39 = vmul.f32 %v1666_v37, %v511_v34  ;;  %vm520_vm1 = vweird.f32 %v1666_v37 }
 0x636   :  { %1667 = vrsqrt.f32 %v512_v38  ;;  %vm521_vm3 = vmor %vm519_vm2, %vm520_vm1  ;;  %vm529_vm5 = vweird.f32 %v512_v38 }
 0x637   :  { %v515_v40 = vmul.f32 %v1666_v37, %v514_v39 }
 0x639   :  { %v516_v41 = vmul.f32 0.5, %v515_v40 }
 0x63b   :  { %v517_v42 = vsub.f32 1.5, %v516_v41 }
 0x63c   :  { %v1668_v43 = vpop.eup %1667 }
 0x63d   :  { %v518_v44 = vmul.f32 %v1666_v37, %v517_v42  ;;  %v524_v46 = vmul.f32 %v1668_v43, %v512_v38  ;;  %vm530_vm4 = vweird.f32 %v1668_v43 }
 0x63e   :  { %vm531_vm6 = vmor %vm529_vm5, %vm530_vm4 }
 0x63f   :  { %v525_v47 = vmul.f32 %v1668_v43, %v524_v46  ;;  %v522_v48 = vsel %vm521_vm3, %v1666_v37, %v518_v44 }
 0x640   :  { %v533_v53 = vmul.f32 %v522_v48, %v499_v24  ;;  %v1597_v48 = vld [vmem:[%s2163_s2 + $0x18] sm:$0xff] }
 0x641   :  { %v526_v51 = vmul.f32 0.5, %v525_v47  ;;  %731 = vmatpush.bf16.msrb.mxu3 %v1597_v48 }
 0x642   :  { %v536_v59 = vmul.f32 %v1624_v54, %v533_v53 }
 0x643   :  { %v527_v52 = vsub.f32 1.5, %v526_v51 }
 0x644   :  { %v539_v63 = vadd.f32 %v1625_v58, %v536_v59 }
 0x645   :  { %v528_v45 = vmul.f32 %v1668_v43, %v527_v52 }
 0x647   :  { %v532_v55 = vsel %vm531_vm6, %v1668_v43, %v528_v45 }
 0x648   :  { %v534_v60 = vmul.f32 %v532_v55, %v500_v28 }
 0x64a   :  { %v537_v61 = vmul.f32 %v1624_v54, %v534_v60  ;;  %v1596_v54 = vld [vmem:[%s2163_s2 + $0x10] sm:$0xff] }
 0x64b   :  { %732 = vmatpush.bf16.msrb.mxu3 %v1596_v54 }
 0x64c   :  { %v540_v0 = vadd.f32 %v1625_v58, %v537_v61 }
 0x64e   :  { %v541_v1 = vpack.c.bf16 %v540_v0, %v539_v63 }
 0x650   :  { %1478 = vmatmul.msk.bf16.vlgmr.msra.gmra.mxu1 %vm42_vm0, %v541_v1 }
 0x6cd   :  { %v572_v6 = vpop.f32.mrf.mxu1 }
 0x6ce   :  { %v573_v7 = vadd.f32 %v1626_v56, %v572_v6 }
 0x6d0   :  { %v577_v8 = vmul.f32 %v573_v7, %v573_v7 }
 0x6d2   :  { %v579_v62 = vmul.f32 %v577_v8, %v573_v7 }
 0x6d4   :  { %v581_v9 = vmul.f32 0.044715, %v579_v62 }
 0x6d5   :  { %v574_v57 = vpop.f32.mrf.mxu1 }
 0x6d6   :  { %v583_v11 = vadd.f32 %v581_v9, %v573_v7  ;;  %v575_v12 = vadd.f32 %v1626_v56, %v574_v57  ;;  %v1629_v57 = vld [vmem:[%s2162_s8 + $0xf] ss:$0 sm:$0xff] }
 0x6d8   :  { %v585_v14 = vmul.f32 0.7978846, %v583_v11  ;;  %v578_v15 = vmul.f32 %v575_v12, %v575_v12 }
 0x6da   :  { %v580_v16 = vmul.f32 %v578_v15, %v575_v12  ;;  %1669 = vtanh.f32 %v585_v14 }
 0x6dc   :  { %v582_v17 = vmul.f32 0.044715, %v580_v16 }
 0x6de   :  { %v584_v18 = vadd.f32 %v582_v17, %v575_v12 }
 0x6e0   :  { %v586_v19 = vmul.f32 0.7978846, %v584_v18  ;;  %v1670_v21 = vpop.eup %1669  ;;  %v1630_v18 = vld [vmem:[%s2162_s8 + $0x10] ss:$0 sm:$0xff] }
 0x6e1   :  { %v589_v22 = vadd.f32 1.0, %v1670_v21 }
 0x6e2   :  { %1671 = vtanh.f32 %v586_v19 }
 0x6e3   :  { %v591_v24 = vmul.f32 0.5, %v589_v22 }
 0x6e5   :  { %v593_v27 = vmul.f32 %v591_v24, %v573_v7  ;;  %v1628_v7 = vld [vmem:[%s2162_s8 + $0xe] ss:$0 sm:$0xff] }
 0x6e8   :  { %v1672_v23 = vpop.eup %1671 }
 0x6e9   :  { %v590_v25 = vadd.f32 1.0, %v1672_v23 }
 0x6eb   :  { %v592_v26 = vmul.f32 0.5, %v590_v25 }
 0x6ed   :  { %v594_v49 = vmul.f32 %v592_v26, %v575_v12 }
 0x6ef   :  { %v595_v28 = vpack.c.bf16 %v594_v49, %v593_v27 }
 0x6f1   :  { %1495 = vmatmul.msk.bf16.vlgmr.msra.gmra.mxu2 %vm630_vm7, %v595_v28 }
 0x774   :  { %v643_v30 = vpop.f32.mrf.mxu2 }
 0x775   :  { %v644_v50 = vadd.f32 %v1627_v29, %v643_v30 }
 0x777   :  { %v648_v31 = vadd.f32 %v644_v50, %v539_v63 }
 0x779   :  { %v652_v32 = vsel %vm42_vm0, %v648_v31, 0.0 }
 0x77a   :  { %653 = vadd.xlane.f32.xlu0 %v652_v32 }
 0x77c   :  { %v645_v33 = vpop.f32.mrf.mxu2 }
 0x77d   :  { %v646_v34 = vadd.f32 %v1627_v29, %v645_v33 }
 0x77f   :  { %v649_v35 = vadd.f32 %v646_v34, %v540_v0 }
 0x781   :  { %v655_v36 = vsel %vm42_vm0, %v649_v35, 0.0 }
 0x782   :  { %656 = vadd.xlane.f32.xlu1 %v655_v36 }
 0x7ed   :  { %v654_v37 = vpop.xlane.xlu0 %653 }
 0x7ee   :  { %v658_v38 = vmul.f32 %v654_v37, %v1791_v10 }
 0x7f0   :  { %v660_v39 = vsub.f32 %v648_v31, %v658_v38 }
 0x7f2   :  { %v662_v40 = vmul.f32 %v660_v39, %v660_v39 }
 0x7f4   :  { %v664_v41 = vsel %vm42_vm0, %v662_v40, 0.0 }
 0x7f5   :  { %v657_v42 = vpop.xlane.xlu1 %656  ;;  %665 = vadd.xlane.f32.xlu2 %v664_v41 }
 0x7f6   :  { %v659_v43 = vmul.f32 %v657_v42, %v1791_v10 }
 0x7f8   :  { %v661_v44 = vsub.f32 %v649_v35, %v659_v43 }
 0x7fa   :  { %v663_v46 = vmul.f32 %v661_v44, %v661_v44 }
 0x7fc   :  { %v667_v47 = vsel %vm42_vm0, %v663_v46, 0.0 }
 0x7fd   :  { %668 = vadd.xlane.f32.xlu0 %v667_v47 }
 0x868   :  { %v666_v51 = vpop.xlane.xlu2 %665 }
 0x869   :  { %v670_v52 = vmul.f32 %v666_v51, %v1791_v10 }
 0x86b   :  { %v672_v53 = vadd.f32 1e-12, %v670_v52 }
 0x86d   :  { %1673 = vrsqrt.f32 %v672_v53  ;;  %vm680_vm12 = vweird.f32 %v672_v53 }
 0x870   :  { %v669_v45 = vpop.xlane.xlu0 %668 }
 0x871   :  { %v671_v55 = vmul.f32 %v669_v45, %v1791_v10 }
 0x873   :  { %v1674_v58 = vpop.eup %1673  ;;  %v673_v59 = vadd.f32 1e-12, %v671_v55 }
 0x874   :  { %v675_v60 = vmul.f32 %v1674_v58, %v672_v53  ;;  %vm681_vm11 = vweird.f32 %v1674_v58 }
 0x875   :  { %1675 = vrsqrt.f32 %v673_v59  ;;  %vm682_vm13 = vmor %vm680_vm12, %vm681_vm11  ;;  %vm690_vm1 = vweird.f32 %v673_v59 }
 0x876   :  { %v676_v61 = vmul.f32 %v1674_v58, %v675_v60 }
 0x878   :  { %v677_v63 = vmul.f32 0.5, %v676_v61 }
 0x87a   :  { %v678_v0 = vsub.f32 1.5, %v677_v63 }
 0x87b   :  { %v1676_v1 = vpop.eup %1675 }
 0x87c   :  { %v679_v2 = vmul.f32 %v1674_v58, %v678_v0  ;;  %v685_v3 = vmul.f32 %v1676_v1, %v673_v59  ;;  %vm691_vm14 = vweird.f32 %v1676_v1 }
 0x87d   :  { %vm692_vm2 = vmor %vm690_vm1, %vm691_vm14 }
 0x87e   :  { %v686_v4 = vmul.f32 %v1676_v1, %v685_v3  ;;  %v683_v56 = vsel %vm682_vm13, %v1674_v58, %v679_v2 }
 0x87f   :  { %v694_v8 = vmul.f32 %v683_v56, %v660_v39 }
 0x880   :  { %v687_v5 = vmul.f32 0.5, %v686_v4 }
 0x881   :  { %v697_v11 = vmul.f32 %v1628_v7, %v694_v8 }
 0x882   :  { %v688_v6 = vsub.f32 1.5, %v687_v5 }
 0x883   :  { %v1970_v15 = vadd.f32 %v1629_v57, %v697_v11 }
 0x884   :  { %v689_v62 = vmul.f32 %v1676_v1, %v688_v6 }
 0x886   :  { %v693_v9 = vsel %vm692_vm2, %v1676_v1, %v689_v62 }
 0x887   :  { %v695_v12 = vmul.f32 %v693_v9, %v661_v44 }
 0x889   :  { %v698_v14 = vmul.f32 %v1628_v7, %v695_v12 }
 0x88b   :  { %v1972_v16 = vadd.f32 %v1629_v57, %v698_v14 }
 0x88d   :  { %v702_v17 = vpack.c.bf16 %v1972_v16, %v1970_v15 }
 0x88f   :  { %1508 = vmatmul.msk.bf16.vlgmr.msrb.gmra.mxu3 %vm42_vm0, %v702_v17 }
 0x912   :  { %v734_v19 = vpop.f32.mrf.mxu3 }
 0x913   :  { %v735_v21 = vadd.f32 %v1630_v18, %v734_v19 }
 0x915   :  { %v739_v22 = vpack.c.bf16 %v735_v21, %v735_v21 }
 0x917   :  { %v742_v23 = vunpack.c.l.b16 %v739_v22 }
 0x919   :  { %v1980_v24 = vpack.c.b16 %v742_v23, %v742_v23 }
 0x91a   :  { %v736_v25 = vpop.f32.mrf.mxu3 }
 0x91b   :  { %v737_v26 = vadd.f32 %v1630_v18, %v736_v25  ;;  %889 = vrot.lane.b32.xlu0 %v1980_v24, %s1716_s30  ;;  %744 = vrot.lane.b32.xlu1 %v1980_v24, %s1717_s12 }
 0x91d   :  { %v740_v27 = vpack.c.bf16 %v737_v26, %v737_v26 }
 0x91f   :  { %v766_v49 = vunpack.c.l.b16 %v740_v27 }
 0x921   :  { %v1986_v28 = vpack.c.b16 %v766_v49, %v766_v49 }
 0x923   :  { %768 = vrot.lane.b32.xlu2 %v1986_v28, %s1717_s12  ;;  %887 = vrot.lane.b32.xlu0 %v1980_v24, %s1718_s13 }
 0x924   :  { %912 = vrot.lane.b32.xlu1 %v1986_v28, %s1716_s30 }
 0x92b   :  { %910 = vrot.lane.b32.xlu2 %v1986_v28, %s1718_s13 }
 0x97d   :  { %v769_v29 = vpop.permute.xlu2 %768 }
 0x97e   :  { %v774_v30 = vsel %vm148_vm8, %v769_v29, 0 }
 0x97f   :  { %783 = vmatpush.bf16.xpose.msrb.mxu1 %v774_v30 }
 0x985   :  { %v911_v36 = vpop.permute.xlu2 %910 }
 0x986   :  { %1510 = vmatmul.msk.bf16.vlgmr.msrb.gmra.mxu1 %vm148_vm8, %v740_v27 }
 0x98d   :  { %v890_v50 = vpop.permute.xlu0 %889  ;;  %v745_v31 = vpop.permute.xlu1 %744 }
 0x98e   :  { %v895_v32 = vsel %vm148_vm8, %v890_v50, 0  ;;  %v750_v33 = vsel %vm148_vm8, %v745_v31, 0 }
 0x98f   :  { %759 = vmatpush.bf16.xpose.msrb.mxu0 %v750_v33 }
 0x995   :  { %v888_v37 = vpop.permute.xlu0 %887 }
 0x996   :  { %v913_v34 = vpop.permute.xlu1 %912  ;;  %1509 = vmatmul.msk.bf16.vlgmr.msrb.gmra.mxu0 %vm148_vm8, %v739_v22 }
 0x997   :  { %904 = vmatpush.bf16.xpose.msra.mxu0 %v895_v32  ;;  %v918_v35 = vsel %vm148_vm8, %v913_v34, 0 }
 0x998   :  { %927 = vmatpush.bf16.xpose.msra.mxu1 %v918_v35 }
 0x99f   :  { %1514 = vmatmul.msk.bf16.vlgmr.msra.gmra.mxu1 %vm148_vm8, %v911_v36 }
 0x9a6   :  { %1513 = vmatmul.msk.bf16.vlgmr.msra.gmra.mxu0 %vm148_vm8, %v888_v37 }
 0xa03   :  { %v785_v38 = vpop.f32.mrf.mxu1 }
 0xa04   :  { %v790_v39 = vmul.f32 0.25, %v785_v38 }
 0xa06   :  { %v792_v40 = vadd.f32 %v790_v39, %v1852_v20 }
 0xa08   :  { %v796_v41 = vsel %vm200_vm9, %v792_v40, -inf }
 0xa09   :  { %797 = vmax.xlane.f32.xlu0 %v796_v41 }
 0xa0b   :  { %v787_v42 = vpop.f32.mrf.mxu1 }
 0xa13   :  { %v761_v43 = vpop.f32.mrf.mxu0 }
 0xa14   :  { %v789_v44 = vmul.f32 0.25, %v761_v43 }
 0xa16   :  { %v791_v46 = vadd.f32 %v789_v44, %v1848_v13 }
 0xa18   :  { %v793_v47 = vsel %vm200_vm9, %v791_v46, -inf }
 0xa19   :  { %794 = vmax.xlane.f32.xlu1 %v793_v47 }
 0xa1b   :  { %v763_v48 = vpop.f32.mrf.mxu0 }
 0xa1c   :  { %v929_v51 = vpop.f32.mrf.mxu1 }
 0xa1d   :  { %v934_v52 = vmul.f32 0.25, %v929_v51 }
 0xa1f   :  { %v936_v54 = vadd.f32 %v934_v52, %v1852_v20 }
 0xa21   :  { %v940_v53 = vsel %vm200_vm9, %v936_v54, -inf }
 0xa22   :  { %941 = vmax.xlane.f32.xlu1 %v940_v53 }
 0xa23   :  { %v906_v45 = vpop.f32.mrf.mxu0 }
 0xa24   :  { %v933_v55 = vmul.f32 0.25, %v906_v45  ;;  %v931_v58 = vpop.f32.mrf.mxu1 }
 0xa26   :  { %v935_v59 = vadd.f32 %v933_v55, %v1848_v13 }
 0xa28   :  { %v937_v60 = vsel %vm200_vm9, %v935_v59, -inf }
 0xa29   :  { %938 = vmax.xlane.f32.xlu2 %v937_v60 }
 0xa2b   :  { %v908_v61 = vpop.f32.mrf.mxu0 }
 0xa41   :  { %843 = vrot.lane.b32.xlu2 %v1980_v24, %s1719_s1 }
 0xa7c   :  { %v798_v63 = vpop.xlane.xlu0 %797 }
 0xa7d   :  { %v800_v0 = vsub.f32 %v792_v40, %v798_v63 }
 0xa7f   :  { %v803_v1 = vmul.f32 1.442695, %v800_v0 }
 0xa81   :  { %1677 = vpow2.f32 %v803_v1 }
 0xa87   :  { %v2014_v20 = vpop.eup %1677 }
 0xa88   :  { %v808_v2 = vsel %vm200_vm9, %v2014_v20, 0.0 }
 0xa89   :  { %809 = vadd.xlane.f32.xlu2 %v808_v2 }
 0xa8c   :  { %v795_v3 = vpop.xlane.xlu1 %794 }
 0xa8d   :  { %v799_v4 = vsub.f32 %v791_v46, %v795_v3 }
 0xa8f   :  { %v801_v13 = vmul.f32 1.442695, %v799_v4 }
 0xa91   :  { %1679 = vpow2.f32 %v801_v13 }
 0xa95   :  { %v942_v56 = vpop.xlane.xlu1 %941 }
 0xa96   :  { %v944_v5 = vsub.f32 %v936_v54, %v942_v56 }
 0xa97   :  { %v1680_v6 = vpop.eup %1679 }
 0xa98   :  { %v947_v7 = vmul.f32 1.442695, %v944_v5  ;;  %v805_v8 = vsel %vm200_vm9, %v1680_v6, 0.0 }
 0xa99   :  { %806 = vadd.xlane.f32.xlu0 %v805_v8 }
 0xa9a   :  { %1681 = vpow2.f32 %v947_v7 }
 0xa9c   :  { %v939_v62 = vpop.xlane.xlu2 %938 }
 0xa9d   :  { %v943_v9 = vsub.f32 %v935_v59, %v939_v62 }
 0xa9f   :  { %v945_v57 = vmul.f32 1.442695, %v943_v9 }
 0xaa0   :  { %v2019_v11 = vpop.eup %1681 }
 0xaa1   :  { %1683 = vpow2.f32 %v945_v57  ;;  %1008 = vrot.lane.b32.xlu2 %v1986_v28, %s1720_s16  ;;  %v952_v12 = vsel %vm200_vm9, %v2019_v11, 0.0 }
 0xaa2   :  { %953 = vadd.xlane.f32.xlu0 %v952_v12 }
 0xaa4   :  { %v844_v14 = vpop.permute.xlu2 %843 }
 0xaa5   :  { %v849_v17 = vsel %vm256_vm10, %v844_v14, 0 }
 0xaa6   :  { %858 = vmatpush.bf16.msrb.mxu2 %v849_v17 }
 0xaa7   :  { %v1684_v18 = vpop.eup %1683 }
 0xaa8   :  { %v949_v19 = vsel %vm200_vm9, %v1684_v18, 0.0 }
 0xaa9   :  { %950 = vadd.xlane.f32.xlu1 %v949_v19 }
 0xab6   :  { %987 = vrot.lane.b32.xlu0 %v1980_v24, %s1720_s16 }
 0xac2   :  { %864 = vrot.lane.b32.xlu1 %v1986_v28, %s1719_s1 }
 0xafc   :  { %v810_v22 = vpop.xlane.xlu2 %809 }
 0xafd   :  { %v837_v52 = vand.u32 2147483648, %v810_v22  ;;  %vm831_vm14 = vweird.f32 %v810_v22  ;;  %v835_v53 = vand.u32 2147483647, %v810_v22 }
 0xaff   :  { %v838_v61 = vor.u32 1.1754944e-38, %v837_v52  ;;  %v1601_v52 = vld [vmem:[%s2166_s4 + $0x18] sm:$0xff] }
 0xb00   :  { %1161 = vmatpush.bf16.msrb.mxu1 %v1601_v52 }
 0xb04   :  { %v1009_v4 = vpop.permute.xlu2 %1008 }
 0xb0c   :  { %v807_v21 = vpop.xlane.xlu0 %806 }
 0xb0d   :  { %1685 = vrcp.f32 %v807_v21  ;;  %v822_v27 = vand.u32 2147483648, %v807_v21  ;;  %v820_v29 = vand.u32 2147483647, %v807_v21  ;;  %vm816_vm4 = vweird.f32 %v807_v21 }
 0xb0e   :  { %1687 = vrcp.f32 %v810_v22 }
 0xb0f   :  { %v823_v31 = vor.u32 1.1754944e-38, %v822_v27  ;;  %vm821_vm6 = vcmp.eq.f32.partialorder %v820_v29, 8.507059e+37 }
 0xb13   :  { %v1686_v23 = vpop.eup %1685 }
 0xb14   :  { %v812_v25 = vmul.f32 %v1686_v23, %v807_v21  ;;  %vm817_vm3 = vweird.f32 %v1686_v23  ;;  %v1688_v30 = vpop.eup %1687 }
 0xb15   :  { %vm818_vm5 = vmor %vm816_vm4, %vm817_vm3  ;;  %v827_v28 = vmul.f32 %v1688_v30, %v810_v22  ;;  %v954_v35 = vpop.xlane.xlu0 %953  ;;  %vm832_vm12 = vweird.f32 %v1688_v30  ;;  %vm836_vm4 = vcmp.eq.f32.partialorder %v835_v53, 8.507059e+37 }
 0xb16   :  { %v813_v26 = vsub.f32 1.0, %v812_v25  ;;  %vm833_vm2 = vmor %vm831_vm14, %vm832_vm12  ;;  %v981_v62 = vand.u32 2147483648, %v954_v35  ;;  %v979_v9 = vand.u32 2147483647, %v954_v35 }
 0xb17   :  { %v828_v37 = vsub.f32 1.0, %v827_v28 }
 0xb18   :  { %v814_v49 = vmul.f32 %v1686_v23, %v813_v26  ;;  %vm980_vm12 = vcmp.eq.f32.partialorder %v979_v9, 8.507059e+37 }
 0xb19   :  { %v829_v40 = vmul.f32 %v1688_v30, %v828_v37 }
 0xb1a   :  { %v815_v50 = vadd.f32 %v1686_v23, %v814_v49  ;;  %v1598_v49 = vld [vmem:[%s2165_s3 + $0x10] sm:$0xff] }
 0xb1b   :  { %v830_v47 = vadd.f32 %v1688_v30, %v829_v40 }
 0xb1c   :  { %v819_v24 = vsel %vm818_vm5, %v1686_v23, %v815_v50  ;;  %v951_v32 = vpop.xlane.xlu1 %950 }
 0xb1d   :  { %v824_v33 = vsel %vm821_vm6, %v823_v31, %v819_v24  ;;  %1689 = vrcp.f32 %v951_v32  ;;  %v966_v42 = vand.u32 2147483648, %v951_v32  ;;  %v964_v44 = vand.u32 2147483647, %v951_v32 }
 0xb1e   :  { %v825_v34 = vmul.f32 %v1680_v6, %v824_v33  ;;  %1691 = vrcp.f32 %v954_v35  ;;  %vm960_vm13 = vweird.f32 %v951_v32  ;;  %v834_v58 = vsel %vm833_vm2, %v1688_v30, %v830_v47 }
 0xb1f   :  { %v967_v45 = vor.u32 1.1754944e-38, %v966_v42  ;;  %vm965_vm3 = vcmp.eq.f32.partialorder %v964_v44, 8.507059e+37  ;;  %v839_v0 = vsel %vm836_vm4, %v838_v61, %v834_v58  ;;  %v1014_v6 = vsel %vm256_vm10, %v1009_v4, 0 }
 0xb20   :  { %v841_v36 = vpack.c.bf16 %v825_v34, %v825_v34  ;;  %v840_v3 = vmul.f32 %v2014_v20, %v839_v0  ;;  %vm975_vm6 = vweird.f32 %v954_v35  ;;  %v982_v20 = vor.u32 1.1754944e-38, %v981_v62 }
 0xb22   :  { %1511 = vmatmul.msk.bf16.vlgmr.msrb.gmra.mxu2 %vm200_vm9, %v841_v36  ;;  %v842_v7 = vpack.c.bf16 %v840_v3, %v840_v3 }
 0xb23   :  { %v1690_v38 = vpop.eup %1689 }
 0xb24   :  { %v956_v39 = vmul.f32 %v1690_v38, %v951_v32  ;;  %vm961_vm11 = vweird.f32 %v1690_v38  ;;  %v1692_v51 = vpop.eup %1691  ;;  %v1631_v32 = vld [vmem:[%s2162_s8 + $0x11] ss:$0 sm:$0xff] }
 0xb25   :  { %vm962_vm1 = vmor %vm960_vm13, %vm961_vm11  ;;  %v971_v59 = vmul.f32 %v1692_v51, %v954_v35  ;;  %vm976_vm5 = vweird.f32 %v1692_v51 }
 0xb26   :  { %v957_v41 = vsub.f32 1.0, %v956_v39  ;;  %vm977_vm11 = vmor %vm975_vm6, %vm976_vm5 }
 0xb27   :  { %v972_v2 = vsub.f32 1.0, %v971_v59 }
 0xb28   :  { %v958_v43 = vmul.f32 %v1690_v38, %v957_v41  ;;  %v988_v46 = vpop.permute.xlu0 %987 }
 0xb29   :  { %v993_v48 = vsel %vm256_vm10, %v988_v46, 0  ;;  %v973_v56 = vmul.f32 %v1692_v51, %v972_v2 }
 0xb2a   :  { %v959_v54 = vadd.f32 %v1690_v38, %v958_v43  ;;  %1002 = vmatpush.bf16.msra.mxu2 %v993_v48 }
 0xb2b   :  { %v974_v8 = vadd.f32 %v1692_v51, %v973_v56 }
 0xb2c   :  { %v963_v55 = vsel %vm962_vm1, %v1690_v38, %v959_v54 }
 0xb2d   :  { %v968_v60 = vsel %vm965_vm3, %v967_v45, %v963_v55  ;;  %v978_v57 = vsel %vm977_vm11, %v1692_v51, %v974_v8  ;;  %v1600_v45 = vld [vmem:[%s2166_s4 + $0x10] sm:$0xff] }
 0xb2e   :  { %v969_v63 = vmul.f32 %v1684_v18, %v968_v60  ;;  %v983_v12 = vsel %vm980_vm12, %v982_v20, %v978_v57  ;;  %1162 = vmatpush.bf16.msrb.mxu1 %v1600_v45  ;;  %v1633_v57 = vld [vmem:[%s2162_s8 + $0x13] ss:$0 sm:$0xff] }
 0xb2f   :  { %v984_v14 = vmul.f32 %v2019_v11, %v983_v12  ;;  %v1599_v11 = vld [vmem:[%s2165_s3 + $0x18] sm:$0xff] }
 0xb30   :  { %v985_v1 = vpack.c.bf16 %v969_v63, %v969_v63  ;;  %1070 = vmatpush.bf16.msrb.mxu0 %v1599_v11  ;;  %v1602_v11 = vld [vmem:[%s2167_s5 + $0x20] sm:$0xff] }
 0xb31   :  { %v986_v17 = vpack.c.bf16 %v984_v14, %v984_v14 }
 0xb32   :  { %1515 = vmatmul.msk.bf16.vlgmr.msra.gmra.mxu2 %vm200_vm9, %v985_v1 }
 0xb34   :  { %v865_v13 = vpop.permute.xlu1 %864  ;;  %1071 = vmatpush.bf16.msrb.mxu0 %v1598_v49 }
 0xb35   :  { %v870_v5 = vsel %vm256_vm10, %v865_v13, 0 }
 0xb36   :  { %879 = vmatpush.bf16.msra.mxu3 %v870_v5 }
 0xb39   :  { %1512 = vmatmul.msk.bf16.vlgmr.msra.gmra.mxu3 %vm200_vm9, %v842_v7  ;;  %v1632_v7 = vld [vmem:[%s2162_s8 + $0x12] ss:$0 sm:$0xff] }
 0xb3a   :  { %1023 = vmatpush.bf16.msrb.mxu3 %v1014_v6 }
 0xb49   :  { %1516 = vmatmul.msk.bf16.vlgmr.msrb.gmra.mxu3 %vm200_vm9, %v986_v17 }
 0xba5   :  { %v860_v18 = vpop.f32.mrf.mxu2 }
 0xba6   :  { %885 = vst.msk [vmem:[#allocation2] sm:$0xff] %vm148_vm8, %v860_v18 }
 0xbad   :  { %v862_v19 = vpop.f32.mrf.mxu2 }
 0xbb5   :  { %v1004_v21 = vpop.f32.mrf.mxu2 }
 0xbb6   :  { %1031 = vrot.lane.b32.xlu0 %v1004_v21, %s1721_s17  ;;  %v1605_v21 = vld [vmem:[%s2167_s5 + $0x38] sm:$0xff] }
 0xbb7   :  { %1230 = vmatpush.bf16.msrb.mxu2 %v1605_v21  ;;  %v1636_v21 = vld [vmem:[%s2162_s8 + $0x16] ss:$0 sm:$0xff] }
 0xbbc   :  { %v881_v22 = vpop.f32.mrf.mxu3 }
 0xbbd   :  { %886 = vst.msk [vmem:[#allocation2 + $0x8] sm:$0xff] %vm148_vm8, %v881_v22  ;;  %v1006_v23 = vpop.f32.mrf.mxu2  ;;  %v1604_v22 = vld [vmem:[%s2167_s5 + $0x30] sm:$0xff] }
 0xbbe   :  { %1231 = vmatpush.bf16.msrb.mxu2 %v1604_v22  ;;  %v1634_v23 = vld [vmem:[%s2162_s8 + $0x14] ss:$0 sm:$0xff] }
 0xbc4   :  { %v883_v25 = vpop.f32.mrf.mxu3 }
 0xbc5   :  { %v1603_v25 = vld [vmem:[%s2167_s5 + $0x28] sm:$0xff] }
 0xbc6   :  { %1232 = vmatpush.bf16.msrb.mxu2 %v1603_v25 }
 0xbca   :  { %1233 = vmatpush.bf16.msrb.mxu2 %v1602_v11 }
 0xbcc   :  { %v1025_v26 = vpop.f32.mrf.mxu3 }
 0xbcd   :  { %1033 = vrot.lane.b32.xlu1 %v1025_v26, %s1721_s17 }
 0xbd4   :  { %v1027_v27 = vpop.f32.mrf.mxu3 }
 0xc28   :  { %v1032_v29 = vpop.permute.xlu0 %1031 }
 0xc29   :  { %1037 = vst.msk [vmem:[#allocation2] sm:$0xff] %vm446_vm15, %v1032_v29 }
 0xc30   :  { %v1039_v50 = vld [vmem:[#allocation2] sm:$0xff] }
 0xc3f   :  { %v1034_v30 = vpop.permute.xlu1 %1033 }
 0xc40   :  { %1038 = vst.msk [vmem:[#allocation2 + $0x8] sm:$0xff] %vm446_vm15, %v1034_v30 }
 0xc47   :  { %v1040_v31 = vld [vmem:[#allocation2 + $0x8] sm:$0xff] }
 0xc48   :  { %v1041_v24 = vpack.c.bf16 %v1040_v31, %v1039_v50 }
 0xc4a   :  { %1529 = vmatmul.msk.bf16.vlgmr.msrb.gmra.mxu0 %vm42_vm0, %v1041_v24 }
 0xcc7   :  { %v1073_v28 = vpop.f32.mrf.mxu0 }
 0xcc8   :  { %v1074_v33 = vadd.f32 %v1631_v32, %v1073_v28 }
 0xcca   :  { %v1078_v34 = vadd.f32 %v1074_v33, %v1970_v15 }
 0xccc   :  { %v1082_v35 = vsel %vm42_vm0, %v1078_v34, 0.0 }
 0xccd   :  { %1083 = vadd.xlane.f32.xlu2 %v1082_v35 }
 0xccf   :  { %v1075_v36 = vpop.f32.mrf.mxu0 }
 0xcd0   :  { %v1076_v37 = vadd.f32 %v1631_v32, %v1075_v36 }
 0xcd2   :  { %v1079_v38 = vadd.f32 %v1076_v37, %v1972_v16 }
 0xcd4   :  { %v1085_v39 = vsel %vm42_vm0, %v1079_v38, 0.0 }
 0xcd5   :  { %1086 = vadd.xlane.f32.xlu0 %v1085_v39 }
 0xd40   :  { %v1084_v40 = vpop.xlane.xlu2 %1083 }
 0xd41   :  { %v1088_v41 = vmul.f32 %v1084_v40, %v1791_v10 }
 0xd43   :  { %v1090_v42 = vsub.f32 %v1078_v34, %v1088_v41 }
 0xd45   :  { %v1092_v43 = vmul.f32 %v1090_v42, %v1090_v42 }
 0xd47   :  { %v1094_v44 = vsel %vm42_vm0, %v1092_v43, 0.0 }
 0xd48   :  { %v1087_v46 = vpop.xlane.xlu0 %1086  ;;  %1095 = vadd.xlane.f32.xlu1 %v1094_v44 }
 0xd49   :  { %v1089_v15 = vmul.f32 %v1087_v46, %v1791_v10 }
 0xd4b   :  { %v1091_v47 = vsub.f32 %v1079_v38, %v1089_v15  ;;  %v1635_v15 = vld [vmem:[%s2162_s8 + $0x15] ss:$0 sm:$0xff] }
 0xd4d   :  { %v1093_v48 = vmul.f32 %v1091_v47, %v1091_v47 }
 0xd4f   :  { %v1097_v51 = vsel %vm42_vm0, %v1093_v48, 0.0 }
 0xd50   :  { %1098 = vadd.xlane.f32.xlu2 %v1097_v51 }
 0xdbb   :  { %v1096_v16 = vpop.xlane.xlu1 %1095 }
 0xdbc   :  { %v1100_v54 = vmul.f32 %v1096_v16, %v1791_v10 }
 0xdbe   :  { %v1102_v53 = vadd.f32 1e-12, %v1100_v54 }
 0xdc0   :  { %1693 = vrsqrt.f32 %v1102_v53  ;;  %vm1110_vm9 = vweird.f32 %v1102_v53 }
 0xdc3   :  { %v1099_v55 = vpop.xlane.xlu2 %1098 }
 0xdc4   :  { %v1101_v58 = vmul.f32 %v1099_v55, %v1791_v10 }
 0xdc6   :  { %v1694_v59 = vpop.eup %1693  ;;  %v1103_v60 = vadd.f32 1e-12, %v1101_v58 }
 0xdc7   :  { %v1105_v61 = vmul.f32 %v1694_v59, %v1102_v53  ;;  %vm1111_vm8 = vweird.f32 %v1694_v59 }
 0xdc8   :  { %1695 = vrsqrt.f32 %v1103_v60  ;;  %vm1112_vm10 = vmor %vm1110_vm9, %vm1111_vm8  ;;  %vm1120_vm13 = vweird.f32 %v1103_v60  ;;  %vm1411_vm8 = vcmask 41984  }
 0xdc9   :  { %v1106_v63 = vmul.f32 %v1694_v59, %v1105_v61 }
 0xdcb   :  { %v1107_v0 = vmul.f32 0.5, %v1106_v63 }
 0xdcd   :  { %v1108_v1 = vsub.f32 1.5, %v1107_v0 }
 0xdce   :  { %v1696_v2 = vpop.eup %1695 }
 0xdcf   :  { %v1109_v3 = vmul.f32 %v1694_v59, %v1108_v1  ;;  %v1115_v4 = vmul.f32 %v1696_v2, %v1103_v60  ;;  %vm1121_vm15 = vweird.f32 %v1696_v2 }
 0xdd0   :  { %vm1122_vm14 = vmor %vm1120_vm13, %vm1121_vm15 }
 0xdd1   :  { %v1116_v13 = vmul.f32 %v1696_v2, %v1115_v4  ;;  %v1113_v56 = vsel %vm1112_vm10, %v1694_v59, %v1109_v3 }
 0xdd2   :  { %v1124_v8 = vmul.f32 %v1113_v56, %v1090_v42 }
 0xdd3   :  { %v1117_v5 = vmul.f32 0.5, %v1116_v13 }
 0xdd4   :  { %v1127_v20 = vmul.f32 %v1632_v7, %v1124_v8 }
 0xdd5   :  { %v1118_v6 = vsub.f32 1.5, %v1117_v5  ;;  %v1607_v5 = vld [vmem:[%s2168_s6 + $0x8] sm:$0xff] }
 0xdd6   :  { %v1130_v17 = vadd.f32 %v1633_v57, %v1127_v20  ;;  %1327 = vmatpush.bf16.msra.mxu3 %v1607_v5 }
 0xdd7   :  { %v1119_v62 = vmul.f32 %v1696_v2, %v1118_v6  ;;  %v1606_v6 = vld [vmem:[%s2168_s6] sm:$0xff] }
 0xdd9   :  { %v1123_v9 = vsel %vm1122_vm14, %v1696_v2, %v1119_v62 }
 0xdda   :  { %v1125_v12 = vmul.f32 %v1123_v9, %v1091_v47  ;;  %1328 = vmatpush.bf16.msra.mxu3 %v1606_v6 }
 0xddc   :  { %v1128_v14 = vmul.f32 %v1632_v7, %v1125_v12 }
 0xdde   :  { %v1131_v18 = vadd.f32 %v1633_v57, %v1128_v14 }
 0xde0   :  { %v1132_v19 = vpack.c.bf16 %v1131_v18, %v1130_v17 }
 0xde2   :  { %1542 = vmatmul.msk.bf16.vlgmr.msrb.gmra.mxu1 %vm42_vm0, %v1132_v19 }
 0xe5f   :  { %v1164_v26 = vpop.f32.mrf.mxu1 }
 0xe60   :  { %v1165_v27 = vadd.f32 %v1634_v23, %v1164_v26 }
 0xe62   :  { %v1169_v49 = vmul.f32 %v1165_v27, %v1165_v27 }
 0xe64   :  { %v1171_v29 = vmul.f32 %v1169_v49, %v1165_v27 }
 0xe66   :  { %v1173_v30 = vmul.f32 0.044715, %v1171_v29 }
 0xe67   :  { %v1166_v50 = vpop.f32.mrf.mxu1 }
 0xe68   :  { %v1175_v31 = vadd.f32 %v1173_v30, %v1165_v27  ;;  %v1167_v24 = vadd.f32 %v1634_v23, %v1166_v50  ;;  %v1637_v23 = vld [vmem:[%s2162_s8 + $0x17] ss:$0 sm:$0xff] }
 0xe6a   :  { %v1177_v32 = vmul.f32 0.7978846, %v1175_v31  ;;  %v1170_v28 = vmul.f32 %v1167_v24, %v1167_v24 }
 0xe6c   :  { %v1172_v33 = vmul.f32 %v1170_v28, %v1167_v24  ;;  %1697 = vtanh.f32 %v1177_v32 }
 0xe6e   :  { %v1174_v34 = vmul.f32 0.044715, %v1172_v33 }
 0xe70   :  { %v1176_v35 = vadd.f32 %v1174_v34, %v1167_v24 }
 0xe72   :  { %v1178_v36 = vmul.f32 0.7978846, %v1176_v35  ;;  %v1698_v37 = vpop.eup %1697  ;;  %v1338_v35 = vld [vmem:[%s2162_s8 + $0x6] sm:$0x1] }
 0xe73   :  { %v1181_v38 = vadd.f32 1.0, %v1698_v37  ;;  %v1609_v37 = vld [vmem:[%s2170_s7 + $0x8] sm:$0xff] }
 0xe74   :  { %1699 = vtanh.f32 %v1178_v36  ;;  %v1339_v36 = vadd.f32 1e-05, %v1338_v35  ;;  %1386 = vmatpush.bf16.msra.mxu0 %v1609_v37 }
 0xe75   :  { %v1183_v40 = vmul.f32 0.5, %v1181_v38 }
 0xe76   :  { %vm1346_vm6 = vweird.f32 %v1339_v36 }
 0xe77   :  { %v1185_v43 = vmul.f32 %v1183_v40, %v1165_v27 }
 0xe7a   :  { %v1700_v39 = vpop.eup %1699 }
 0xe7b   :  { %v1182_v41 = vadd.f32 1.0, %v1700_v39  ;;  %v1608_v39 = vld [vmem:[%s2170_s7] sm:$0xff] }
 0xe7c   :  { %1387 = vmatpush.bf16.msra.mxu0 %v1608_v39 }
 0xe7d   :  { %v1184_v42 = vmul.f32 0.5, %v1182_v41 }
 0xe7f   :  { %v1186_v44 = vmul.f32 %v1184_v42, %v1167_v24 }
 0xe81   :  { %v1187_v46 = vpack.c.bf16 %v1186_v44, %v1185_v43  ;;  %v1638_v43 = vld [vmem:[%s2162_s8 + $0x2] ss:$0 sm:$0xff] }
 0xe83   :  { %1567 = vmatmul.msk.bf16.vlgmr.msrb.gmra.mxu2 %vm630_vm7, %v1187_v46 }
 0xf06   :  { %v1235_v47 = vpop.f32.mrf.mxu2 }
 0xf07   :  { %v1236_v48 = vadd.f32 %v1635_v15, %v1235_v47 }
 0xf09   :  { %v1240_v51 = vadd.f32 %v1236_v48, %v1130_v17 }
 0xf0b   :  { %v1244_v16 = vsel %vm42_vm0, %v1240_v51, 0.0 }
 0xf0c   :  { %1245 = vadd.xlane.f32.xlu0 %v1244_v16 }
 0xf0e   :  { %v1237_v52 = vpop.f32.mrf.mxu2 }
 0xf0f   :  { %v1238_v54 = vadd.f32 %v1635_v15, %v1237_v52 }
 0xf11   :  { %v1241_v53 = vadd.f32 %v1238_v54, %v1131_v18 }
 0xf13   :  { %v1247_v45 = vsel %vm42_vm0, %v1241_v53, 0.0 }
 0xf14   :  { %1248 = vadd.xlane.f32.xlu1 %v1247_v45  ;;  %v1640_v45 = vld [vmem:[%s2162_s8 + $0x3] ss:$0 sm:$0xff] }
 0xf7f   :  { %v1246_v55 = vpop.xlane.xlu0 %1245 }
 0xf80   :  { %v1250_v58 = vmul.f32 %v1246_v55, %v1791_v10 }
 0xf82   :  { %v1252_v59 = vsub.f32 %v1240_v51, %v1250_v58  ;;  %v1639_v51 = vld [vmem:[%s2162_s8 + $0x5] ss:$0 sm:$0xff]  ;;  %v1641_v58 = vld [vmem:[%s2162_s8 + $0x4] ss:$0 sm:$0xff] }
 0xf84   :  { %v1254_v60 = vmul.f32 %v1252_v59, %v1252_v59 }
 0xf86   :  { %v1256_v61 = vsel %vm42_vm0, %v1254_v60, 0.0 }
 0xf87   :  { %v1249_v63 = vpop.xlane.xlu1 %1248  ;;  %1257 = vadd.xlane.f32.xlu2 %v1256_v61 }
 0xf88   :  { %v1251_v0 = vmul.f32 %v1249_v63, %v1791_v10  ;;  %v1642_v63 = vld [vmem:[%s2162_s8 + $0x7] ss:$0 sm:$0xff] }
 0xf8a   :  { %v1253_v1 = vsub.f32 %v1241_v53, %v1251_v0 }
 0xf8c   :  { %v1255_v2 = vmul.f32 %v1253_v1, %v1253_v1 }
 0xf8e   :  { %v1259_v3 = vsel %vm42_vm0, %v1255_v2, 0.0 }
 0xf8f   :  { %1260 = vadd.xlane.f32.xlu0 %v1259_v3 }
 0xffa   :  { %v1258_v4 = vpop.xlane.xlu2 %1257 }
 0xffb   :  { %v1262_v13 = vmul.f32 %v1258_v4, %v1791_v10 }
 0xffd   :  { %v1264_v56 = vadd.f32 1e-12, %v1262_v13 }
 0xfff   :  { %1701 = vrsqrt.f32 %v1264_v56  ;;  %vm1272_vm1 = vweird.f32 %v1264_v56 }
0x1002   :  { %v1261_v7 = vpop.xlane.xlu0 %1260 }
0x1003   :  { %v1263_v8 = vmul.f32 %v1261_v7, %v1791_v10  ;;  %v1393_v7 = vld [vmem:[%s2171_s9] sm:$0x3] }
0x1005   :  { %v1702_v62 = vpop.eup %1701  ;;  %v1265_v9 = vadd.f32 1e-12, %v1263_v8 }
0x1006   :  { %v1267_v57 = vmul.f32 %v1702_v62, %v1264_v56  ;;  %vm1273_vm7 = vweird.f32 %v1702_v62 }
0x1007   :  { %1703 = vrsqrt.f32 %v1265_v9  ;;  %vm1274_vm2 = vmor %vm1272_vm1, %vm1273_vm7  ;;  %vm1282_vm4 = vweird.f32 %v1265_v9 }
0x1008   :  { %v1268_v20 = vmul.f32 %v1702_v62, %v1267_v57  ;;  %1705 = vrsqrt.f32 %v1339_v36 }
0x100a   :  { %v1269_v12 = vmul.f32 0.5, %v1268_v20 }
0x100c   :  { %v1270_v14 = vsub.f32 1.5, %v1269_v12 }
0x100d   :  { %v1704_v17 = vpop.eup %1703 }
0x100e   :  { %v1271_v18 = vmul.f32 %v1702_v62, %v1270_v14  ;;  %v1277_v19 = vmul.f32 %v1704_v17, %v1265_v9  ;;  %vm1283_vm3 = vweird.f32 %v1704_v17  ;;  %v1706_v38 = vpop.eup %1705 }
0x100f   :  { %vm1284_vm5 = vmor %vm1282_vm4, %vm1283_vm3  ;;  %v1341_v40 = vmul.f32 %v1706_v38, %v1339_v36  ;;  %vm1347_vm11 = vweird.f32 %v1706_v38 }
0x1010   :  { %v1275_v22 = vsel %vm1274_vm2, %v1702_v62, %v1271_v18  ;;  %v1278_v10 = vmul.f32 %v1704_v17, %v1277_v19  ;;  %vm1348_vm12 = vmor %vm1346_vm6, %vm1347_vm11 }
0x1011   :  { %v1286_v25 = vmul.f32 %v1275_v22, %v1252_v59  ;;  %v1342_v41 = vmul.f32 %v1706_v38, %v1341_v40 }
0x1012   :  { %v1279_v26 = vmul.f32 0.5, %v1278_v10 }
0x1013   :  { %v1289_v27 = vmul.f32 %v1636_v21, %v1286_v25  ;;  %v1343_v42 = vmul.f32 0.5, %v1342_v41 }
0x1014   :  { %v1280_v11 = vsub.f32 1.5, %v1279_v26 }
0x1015   :  { %v1292_v49 = vadd.f32 %v1637_v23, %v1289_v27  ;;  %v1344_v44 = vsub.f32 1.5, %v1343_v42 }
0x1016   :  { %v1281_v29 = vmul.f32 %v1704_v17, %v1280_v11 }
0x1017   :  { %v1294_v30 = vsel %vm42_vm0, %v1292_v49, 0.0  ;;  %v1345_v47 = vmul.f32 %v1706_v38, %v1344_v44  ;;  %v1722_v49 = vmov 12.0  }
0x1018   :  { %v1285_v50 = vsel %vm1284_vm5, %v1704_v17, %v1281_v29  ;;  %1296 = vst [vmem:[%s2169_s10] sm:$0xff] %v1294_v30 }
0x1019   :  { %v1287_v31 = vmul.f32 %v1285_v50, %v1253_v1  ;;  %v1349_v48 = vsel %vm1348_vm12, %v1706_v38, %v1345_v47 }
0x101a   :  { %v1350_v16 = vperm.slane %v1349_v48, 0 }
0x101b   :  { %v1290_v24 = vmul.f32 %v1636_v21, %v1287_v31 }
0x101d   :  { %v1293_v32 = vadd.f32 %v1637_v23, %v1290_v24  ;;  %v1431_v24 = vlaneseq }
0x101f   :  { %v1295_v28 = vsel %vm42_vm0, %v1293_v32, 0.0 }
0x1020   :  { %1297 = vst [vmem:[%s2169_s10 + $0x8] sm:$0xff] %v1295_v28  ;;  %v1432_v28 = vand.u32 127, %v1431_v24 }
0x1022   :  { %vm1433_vm10 = vcmp.eq.s32.totalorder %v1432_v28, 6 }
0x1027   :  { %v1298_v33 = vld [vmem:[%s2169_s10] ss:$8 sm:$0x3] }
0x1028   :  { %v1299_v34 = vpack.c.bf16 %v1298_v33, %v1298_v33 }
0x102a   :  { %1576 = vmatmul.msk.bf16.vlgmr.msra.gmra.mxu3 %vm42_vm0, %v1299_v34 }
0x10ad   :  { %v1330_v46 = vpop.f32.mrf.mxu3 }
0x10ae   :  { %v1331_v15 = vadd.f32 %v1638_v43, %v1330_v46 }
0x10b0   :  { %1707 = vtanh.f32 %v1331_v15 }
0x10b5   :  { %v1332_v52 = vpop.f32.mrf.mxu3 }
0x10b6   :  { %v1708_v54 = vpop.eup %1707 }
0x10b7   :  { %v1337_v53 = vsub.f32 %v1708_v54, %v1639_v51 }
0x10b9   :  { %v1351_v55 = vmul.f32 %v1350_v16, %v1337_v53 }
0x10bb   :  { %v1354_v59 = vmul.f32 %v1640_v45, %v1351_v55 }
0x10bd   :  { %v1357_v60 = vadd.f32 %v1641_v58, %v1354_v59 }
0x10bf   :  { %v1358_v61 = vpack.c.bf16 %v1357_v60, %v1357_v60 }
0x10c1   :  { %1585 = vmatmul.msk.bf16.vlgmr.msra.gmra.mxu0 %vm42_vm0, %v1358_v61 }
0x113e   :  { %v1389_v0 = vpop.f32.mrf.mxu0 }
0x113f   :  { %v1390_v1 = vadd.f32 %v1642_v63, %v1389_v0 }
0x1141   :  { %v1397_v2 = vand.u32 2147483647, %v1390_v1  ;;  %v1394_v62 = vmax.f32 %v1390_v1, 0.0  ;;  %v1395_v9 = vmul.f32 %v1393_v7, %v1390_v1 }
0x1143   :  { %v1398_v3 = vsub.f32 0.0, %v1397_v2  ;;  %v1396_v17 = vsub.f32 %v1394_v62, %v1395_v9 }
0x1145   :  { %v1399_v4 = vmul.f32 1.442695, %v1398_v3 }
0x1146   :  { %v1391_v13 = vpop.f32.mrf.mxu0 }
0x1147   :  { %1709 = vpow2.f32 %v1399_v4 }
0x114d   :  { %v1710_v56 = vpop.eup %1709 }
0x114e   :  { %v1401_v5 = vadd.f32 1.0, %v1710_v56  ;;  %v1404_v6 = vmul.f32 -0.5, %v1710_v56  ;;  %v1407_v57 = vand.u32 2147483647, %v1710_v56 }
0x1150   :  { %1711 = vlog2.f32 %v1401_v5  ;;  %v1405_v8 = vadd.f32 1.0, %v1404_v6  ;;  %vm1408_vm0 = vcmp.lt.f32.partialorder %v1407_v57, 0.0004427343 }
0x1151   :  { %1713 = vrcp.f32 %v1722_v49 }
0x1152   :  { %v1406_v14 = vmul.f32 %v1710_v56, %v1405_v8 }
0x1156   :  { %v1712_v20 = vpop.eup %1711 }
0x1157   :  { %v1403_v12 = vmul.f32 0.6931472, %v1712_v20  ;;  %v1714_v29 = vpop.eup %1713 }
0x1158   :  { %v1424_v30 = vmul.f32 12.0, %v1714_v29  ;;  %vm1428_vm9 = vweird.f32 %v1714_v29 }
0x1159   :  { %v1409_v18 = vsel %vm1408_vm0, %v1406_v14, %v1403_v12 }
0x115a   :  { %v1410_v19 = vadd.f32 %v1409_v18, %v1396_v17  ;;  %v1425_v50 = vsub.f32 1.0, %v1424_v30 }
0x115c   :  { %v1412_v21 = vsel %vm1411_vm8, %v1410_v19, 0.0  ;;  %v1426_v31 = vmul.f32 %v1714_v29, %v1425_v50 }
0x115d   :  { %1413 = vadd.xlane.f32.xlu1 %v1412_v21 }
0x115e   :  { %v1427_v32 = vadd.f32 %v1714_v29, %v1426_v31 }
0x1160   :  { %v1429_v33 = vsel %vm1428_vm9, %v1714_v29, %v1427_v32 }
0x11d0   :  { %v1414_v22 = vpop.xlane.xlu1 %1413 }
0x11d1   :  { %v1415_v10 = vrot.slane %v1414_v22, 4 }
0x11d3   :  { %v1416_v23 = vadd.f32 %v1415_v10, %v1414_v22 }
0x11d5   :  { %v1417_v25 = vrot.slane %v1416_v23, 2 }
0x11d7   :  { %v1418_v26 = vadd.f32 %v1417_v25, %v1416_v23 }
0x11d9   :  { %v1419_v27 = vrot.slane %v1418_v26, 1 }
0x11db   :  { %v1420_v11 = vadd.f32 %v1419_v27, %v1418_v26 }
0x11dd   :  { %1610 = vpush %v1420_v11 }
0x120e   :  { %s1611_s8 = spop %1610 }
0x120f   :  { %v1422_v34 = vstv %s1611_s8 }
0x1210   :  { %v1430_v35 = vmul.f32 %v1429_v33, %v1422_v34 }
0x1212   :  { %v1434_v36 = vsel %vm1433_vm10, %v1430_v35, %v1390_v1 }
0x1213   :  { %1435 = vst [vmem:[%s2172_s11] sm:$0x3] %v1434_v36 }

</bundles_post_ra>
